<compile_context>
chip_gen: v7x
topology: tpu7x:2x2x1
jax: 0.10.0
libtpu: 0.0.40
codegen_flags: <defaults>
</compile_context>

<pallas_src>
import functools

import jax
import jax.numpy as jnp
from jax.experimental import pallas as pl
from jax.experimental.pallas import tpu as pltpu


def _rup(n, m=128):
    return ((n + m - 1) // m) * m


# ---------------------------------------------------------------------------
# Kernel 1: fused 2-layer GIN (+ attention pre-activation) for one adjacency
# branch; grid=(2,) iterates / parallelizes the two branches.
# ---------------------------------------------------------------------------
def gin_pair_kernel(a_ref, x_ref, w1a_ref, b1a_ref, w1b_ref, b1b_ref,
                    w2a_ref, b2a_ref, w2b_ref, b2b_ref, aw1_ref, ab1_ref,
                    e_ref, pre_ref):
    # Adjacency stored as bf16 (0/1 -> lossless); aggregate in f32 for torch-f32 numerics.
    a = a_ref[...].astype(jnp.float32)                                # [N, N]
    x = x_ref[...]                                                    # [N, FP]

    # --- gc1: mlp((1+eps)*x + A@x), eps = 0; GIN applies ReLU afterwards ---
    h = x + jnp.dot(a, x, preferred_element_type=jnp.float32)
    h = jnp.maximum(
        jnp.dot(h, w1a_ref[...], preferred_element_type=jnp.float32) + b1a_ref[...], 0.0)
    h = jnp.dot(h, w1b_ref[...], preferred_element_type=jnp.float32) + b1b_ref[...]
    h = jnp.maximum(h, 0.0)
    # TODO(synk): F.dropout is identity in eval mode; training-mode dropout not modeled.

    # --- gc2 (no outer ReLU) ---
    g = h + jnp.dot(a, h, preferred_element_type=jnp.float32)
    g = jnp.maximum(
        jnp.dot(g, w2a_ref[...], preferred_element_type=jnp.float32) + b2a_ref[...], 0.0)
    e = jnp.dot(g, w2b_ref[...], preferred_element_type=jnp.float32) + b2b_ref[...]

    e_ref[...] = e
    # per-branch pre-tanh attention activation, computed here so it runs branch-parallel
    pre_ref[...] = jnp.dot(e, aw1_ref[...], preferred_element_type=jnp.float32) + ab1_ref[...]


def gin_pair(adj, xp, gp, aw1, ab1, N, FP, H1P, H2P, AHP):
    grid_spec = pltpu.PrefetchScalarGridSpec(
        num_scalar_prefetch=0,
        grid=(2,),                                       # branch 0 = sadj, branch 1 = fadj
        in_specs=[
            pl.BlockSpec((None, N, N), lambda i: (i, 0, 0)),   # adjacency of this branch
            pl.BlockSpec((N, FP), lambda i: (0, 0)),           # x (resident across branches)
            pl.BlockSpec((FP, H1P), lambda i: (0, 0)),
            pl.BlockSpec((1, H1P), lambda i: (0, 0)),
            pl.BlockSpec((H1P, H1P), lambda i: (0, 0)),
            pl.BlockSpec((1, H1P), lambda i: (0, 0)),
            pl.BlockSpec((H1P, H2P), lambda i: (0, 0)),
            pl.BlockSpec((1, H2P), lambda i: (0, 0)),
            pl.BlockSpec((H2P, H2P), lambda i: (0, 0)),
            pl.BlockSpec((1, H2P), lambda i: (0, 0)),
            pl.BlockSpec((H2P, AHP), lambda i: (0, 0)),
            pl.BlockSpec((1, AHP), lambda i: (0, 0)),
        ],
        out_specs=(
            pl.BlockSpec((None, N, H2P), lambda i: (i, 0, 0)),
            pl.BlockSpec((None, N, AHP), lambda i: (i, 0, 0)),
        ),
    )
    return pl.pallas_call(
        gin_pair_kernel,
        out_shape=(jax.ShapeDtypeStruct((2, N, H2P), jnp.float32),
                   jax.ShapeDtypeStruct((2, N, AHP), jnp.float32)),
        grid_spec=grid_spec,
        compiler_params=pltpu.CompilerParams(
            dimension_semantics=("parallel",),           # v7x: one branch per TensorCore
            vmem_limit_bytes=64 * 1024 * 1024),
    )(adj, xp, gp["w1a"], gp["b1a"], gp["w1b"], gp["b1b"],
      gp["w2a"], gp["b2a"], gp["w2b"], gp["b2b"], aw1, ab1)


# ---------------------------------------------------------------------------
# Kernel 2: SpatialAttention + (MLP | BN-folded decoder trunk) + ZINB heads
# ---------------------------------------------------------------------------
def head_kernel(embs_ref, pre_ref, aw2_ref, wf_ref, bf_ref, wh_ref, bh_ref,
                emb_ref, pi_ref, var_ref, mean_ref, *, h2p, fp):
    e1 = embs_ref[0]                                                  # [N, H2P]
    e2 = embs_ref[1]
    com = (e1 + e2) * 0.5                                             # middle branch in-kernel

    pre1 = pre_ref[0]                                                 # [N, AHP]
    pre2 = pre_ref[1]
    prec = (pre1 + pre2) * 0.5                                        # linearity of aw1 proj

    aw2 = aw2_ref[...]                                                # [1, AHP] row vector
    # width-1 projection as VPU multiply + lane reduce (no [.,AHP]@[AHP,1] MXU push)
    s1 = jnp.sum(jnp.tanh(pre1) * aw2, axis=-1, keepdims=True)
    sc = jnp.sum(jnp.tanh(prec) * aw2, axis=-1, keepdims=True)
    s2 = jnp.sum(jnp.tanh(pre2) * aw2, axis=-1, keepdims=True)

    m = jnp.maximum(jnp.maximum(s1, sc), s2)                          # stable softmax (3 branches)
    x1 = jnp.exp(s1 - m)
    xc = jnp.exp(sc - m)
    x2 = jnp.exp(s2 - m)
    inv = pl.reciprocal(x1 + xc + x2, approx=False)
    att = (x1 * e1 + xc * com + x2 * e2) * inv                        # (beta * z).sum(dim=1)

    # one fused lane-dense matmul producing [emb | BN-folded decoder-trunk pre-ReLU]
    z = jnp.dot(att, wf_ref[...], preferred_element_type=jnp.float32) + bf_ref[...]
    emb_ref[...] = z[:, :h2p]
    h = jnp.maximum(z[:, h2p:], 0.0)

    # fused ZINB heads: one lane-dense matmul for [pi | var | mean]
    y = jnp.dot(h, wh_ref[...], preferred_element_type=jnp.float32) + bh_ref[...]
    zpi = y[:, 0 * fp:1 * fp]
    zv = y[:, 1 * fp:2 * fp]
    zm = y[:, 2 * fp:3 * fp]

    pi_ref[...] = 1.0 / (1.0 + jnp.exp(-zpi))                         # sigmoid
    sp = jnp.maximum(zv, 0.0) + jnp.log(1.0 + jnp.exp(-jnp.abs(zv)))  # stable softplus
    var_ref[...] = jnp.clip(sp, 1e-4, 1e4)
    mean_ref[...] = jnp.clip(jnp.exp(zm), 1e-5, 1e6)


def head(embs, pre, hp, N, FP, H1P, H2P):
    kernel = functools.partial(head_kernel, h2p=H2P, fp=FP)
    return pl.pallas_call(
        kernel,
        out_shape=(
            jax.ShapeDtypeStruct((N, H2P), jnp.float32),
            jax.ShapeDtypeStruct((N, FP), jnp.float32),
            jax.ShapeDtypeStruct((N, FP), jnp.float32),
            jax.ShapeDtypeStruct((N, FP), jnp.float32),
        ),
        in_specs=[pl.BlockSpec(memory_space=pltpu.MemorySpace.VMEM)] * 7,
        out_specs=(pl.BlockSpec(memory_space=pltpu.MemorySpace.VMEM),) * 4,
        compiler_params=pltpu.CompilerParams(vmem_limit_bytes=64 * 1024 * 1024),
    )(embs, pre, hp["aw2"], hp["wf"], hp["bf"], hp["wh"], hp["bh"])


# ---------------------------------------------------------------------------
# Host-side parameter packing: lane-pad to 128, fold BN into the fused
# (MLP @ decoder-trunk) weight, fuse decoder heads.
# ---------------------------------------------------------------------------
def pack_params(gp, hp, nfeat, nhid1, nhid2, att_h):
    FP, H1P, H2P, AHP = _rup(nfeat), _rup(nhid1), _rup(nhid2), _rup(att_h)

    def pad2(a, r, c):
        return jnp.pad(a, ((0, r - a.shape[0]), (0, c - a.shape[1])))

    gpk = dict(
        w1a=pad2(gp["w1a"], FP, H1P), b1a=pad2(gp["b1a"], 1, H1P),
        w1b=pad2(gp["w1b"], H1P, H1P), b1b=pad2(gp["b1b"], 1, H1P),
        w2a=pad2(gp["w2a"], H1P, H2P), b2a=pad2(gp["b2a"], 1, H2P),
        w2b=pad2(gp["w2b"], H2P, H2P), b2b=pad2(gp["b2b"], 1, H2P),
    )

    # BatchNorm1d (eval) folded into a per-channel scale/shift (handles any running
    # stats), then re-associated into the fused MLP->trunk weight.
    bn_scale = hp["bng"] / jnp.sqrt(hp["bn_var"] + 1e-5)              # [1, nhid1]
    bn_shift = hp["bnb"] - hp["bn_mean"] * bn_scale

    w_trunk = (hp["mw"] @ hp["dw"]) * bn_scale                        # [nhid2, nhid1]
    b_trunk = (hp["mb"] @ hp["dw"] + hp["db"]) * bn_scale + bn_shift  # [1, nhid1]

    hpk = dict(
        aw1=pad2(hp["aw1"], H2P, AHP), ab1=pad2(hp["ab1"], 1, AHP),
        aw2=pad2(hp["aw2"].T, 1, AHP),                 # row vector for VPU mul + lane reduce
        wf=jnp.concatenate([pad2(hp["mw"], H2P, H2P),
                            pad2(w_trunk, H2P, H1P)], axis=1),        # [H2P, H2P+H1P]
        bf=jnp.concatenate([pad2(hp["mb"], 1, H2P),
                            pad2(b_trunk, 1, H1P)], axis=1),
        wh=jnp.concatenate([pad2(hp["piw"], H1P, FP),
                            pad2(hp["vw"], H1P, FP),
                            pad2(hp["mnw"], H1P, FP)], axis=1),       # [H1P, 3*FP]
        bh=jnp.concatenate([pad2(hp["pib"], 1, FP),
                            pad2(hp["vb"], 1, FP),
                            pad2(hp["mnb"], 1, FP)], axis=1),
    )
    dims = dict(FP=FP, H1P=H1P, H2P=H2P, AHP=AHP)
    return gpk, hpk, dims


# ---------------------------------------------------------------------------
# Full ConMGIN forward
# ---------------------------------------------------------------------------
def conmgin_forward(x, sadj, fadj, gpk, hpk, dims, nfeat, nhid2):
    N = x.shape[0]
    FP, H1P, H2P, AHP = dims["FP"], dims["H1P"], dims["H2P"], dims["AHP"]

    xp = jnp.pad(x, ((0, 0), (0, FP - x.shape[1])))
    # 0/1 adjacency -> bf16 is lossless; halves HBM bytes of the dominant operand.
    adj = jnp.stack([sadj, fadj], axis=0).astype(jnp.bfloat16)

    embs, pre = gin_pair(adj, xp, gpk, hpk["aw1"], hpk["ab1"], N, FP, H1P, H2P, AHP)
    emb, pi, var, mean = head(embs, pre, hpk, N, FP, H1P, H2P)

    emb1 = embs[0, :, :nhid2]
    emb2 = embs[1, :, :nhid2]
    return emb1, emb2, emb[:, :nhid2], pi[:, :nfeat], var[:, :nfeat], mean[:, :nfeat]


# ---------------------------------------------------------------------------
# Pure-JAX reference for verification (mirrors the PyTorch module in f32)
# ---------------------------------------------------------------------------
def _ref_gin(x, a, p):
    h = x + a @ x
    h = jnp.maximum(h @ p["w1a"] + p["b1a"], 0.0)
    h = h @ p["w1b"] + p["b1b"]
    h = jnp.maximum(h, 0.0)
    g = h + a @ h
    g = jnp.maximum(g @ p["w2a"] + p["b2a"], 0.0)
    g = g @ p["w2b"] + p["b2b"]
    return g


def _ref_forward(x, sadj, fadj, gp, hp):
    e1 = _ref_gin(x, sadj, gp)
    e2 = _ref_gin(x, fadj, gp)
    z = jnp.stack([e1, (e1 + e2) / 2.0, e2], axis=1)                  # [N, 3, D2]
    w = jnp.tanh(z @ hp["aw1"] + hp["ab1"]) @ hp["aw2"]               # [N, 3, 1]
    beta = jax.nn.softmax(w, axis=1)
    att = (beta * z).sum(axis=1)
    emb = att @ hp["mw"] + hp["mb"]
    h = emb @ hp["dw"] + hp["db"]
    h = (h - hp["bn_mean"]) / jnp.sqrt(hp["bn_var"] + 1e-5) * hp["bng"] + hp["bnb"]
    h = jnp.maximum(h, 0.0)
    pi = jax.nn.sigmoid(h @ hp["piw"] + hp["pib"])
    var = jnp.clip(jax.nn.softplus(h @ hp["vw"] + hp["vb"]), 1e-4, 1e4)
    mean = jnp.clip(jnp.exp(h @ hp["mnw"] + hp["mnb"]), 1e-5, 1e6)
    return e1, e2, emb, pi, var, mean


# ---------------------------------------------------------------------------
if __name__ == "__main__":
    N, NFEAT, NHID1, NHID2, ATT_H = 16, 32, 32, 16, 16

    key = jax.random.PRNGKey(0)
    keys = iter(jax.random.split(key, 64))

    def linear(fan_in, fan_out, bias=True):
        lim = 1.0 / jnp.sqrt(jnp.float32(fan_in))
        w = jax.random.uniform(next(keys), (fan_in, fan_out), jnp.float32, -lim, lim)
        b = (jax.random.uniform(next(keys), (1, fan_out), jnp.float32, -lim, lim)
             if bias else None)
        return w, b

    # GIN parameters (shared by both adjacency passes, like self.MGIN)
    w1a, b1a = linear(NFEAT, NHID1)
    w1b, b1b = linear(NHID1, NHID1)
    w2a, b2a = linear(NHID1, NHID2)
    w2b, b2b = linear(NHID2, NHID2)
    gp = dict(w1a=w1a, b1a=b1a, w1b=w1b, b1b=b1b,
              w2a=w2a, b2a=b2a, w2b=w2b, b2b=b2b)

    # attention / MLP / decoder parameters
    aw1, ab1 = linear(NHID2, ATT_H)
    aw2, _ = linear(ATT_H, 1, bias=False)
    mw, mb = linear(NHID2, NHID2)
    dw, db = linear(NHID2, NHID1)
    bng = jnp.ones((1, NHID1), jnp.float32)
    bnb = jnp.zeros((1, NHID1), jnp.float32)
    bn_mean = jnp.zeros((1, NHID1), jnp.float32)   # BatchNorm1d eval running stats
    bn_var = jnp.ones((1, NHID1), jnp.float32)
    piw, pib = linear(NHID1, NFEAT)
    vw, vb = linear(NHID1, NFEAT)
    mnw, mnb = linear(NHID1, NFEAT)
    hp = dict(aw1=aw1, ab1=ab1, aw2=aw2, mw=mw, mb=mb,
              dw=dw, db=db, bng=bng, bnb=bnb, bn_mean=bn_mean, bn_var=bn_var,
              piw=piw, pib=pib, vw=vw, vb=vb, mnw=mnw, mnb=mnb)

    # inputs: node features + two dense symmetric adjacencies (coalesced sparse -> dense)
    x = jax.random.normal(next(keys), (N, NFEAT), jnp.float32)
    s_raw = (jax.random.uniform(next(keys), (N, N)) < 0.25).astype(jnp.float32)
    f_raw = (jax.random.uniform(next(keys), (N, N)) < 0.25).astype(jnp.float32)
    eye = jnp.eye(N, dtype=jnp.float32)
    sadj = jnp.clip(s_raw + s_raw.T, 0.0, 1.0) * (1.0 - eye)
    fadj = jnp.clip(f_raw + f_raw.T, 0.0, 1.0) * (1.0 - eye)

    gpk, hpk, dims = pack_params(gp, hp, NFEAT, NHID1, NHID2, ATT_H)

    outs = conmgin_forward(x, sadj, fadj, gpk, hpk, dims, NFEAT, NHID2)
    outs = jax.block_until_ready(outs)

    refs = _ref_forward(x, sadj, fadj, gp, hp)
    for o, r in zip(outs, refs):
        assert o.shape == r.shape and o.dtype == r.dtype
        # 2e-3 tolerance: VPU mul+reduce attention score, linearity identity for the
        # com branch, and host-side re-association of the MLP/trunk/BN matmul chain.
        assert jnp.allclose(o, r, atol=2e-3, rtol=2e-3), "mismatch vs reference"

    print("KERNEL_OK")
</pallas_src>

<mosaic_0001>
module attributes {stable_mosaic.version = 11 : i64} {
  func.func @gin_pair_kernel(%arg0: i32, %arg1: memref<1x16x16xbf16, #tpu.memory_space<vmem>>, %arg2: memref<16x128xf32, #tpu.memory_space<vmem>>, %arg3: memref<128x128xf32, #tpu.memory_space<vmem>>, %arg4: memref<1x128xf32, #tpu.memory_space<vmem>>, %arg5: memref<128x128xf32, #tpu.memory_space<vmem>>, %arg6: memref<1x128xf32, #tpu.memory_space<vmem>>, %arg7: memref<128x128xf32, #tpu.memory_space<vmem>>, %arg8: memref<1x128xf32, #tpu.memory_space<vmem>>, %arg9: memref<128x128xf32, #tpu.memory_space<vmem>>, %arg10: memref<1x128xf32, #tpu.memory_space<vmem>>, %arg11: memref<128x128xf32, #tpu.memory_space<vmem>>, %arg12: memref<1x128xf32, #tpu.memory_space<vmem>>, %arg13: memref<1x16x128xf32, #tpu.memory_space<vmem>>, %arg14: memref<1x16x128xf32, #tpu.memory_space<vmem>>) attributes {dimension_semantics = [#tpu.dimension_semantics<parallel>], iteration_bounds = array<i64: 2>, scalar_prefetch = 0 : i64, scratch_operands = 0 : i64, tpu.core_type = #tpu.core_type<tc>, window_params = [{transform_indices = @transform_0, window_bounds = array<i64: 1, 16, 16>}, {pipeline_mode = #tpu.pipeline_mode<synchronous>, transform_indices = @transform_1, window_bounds = array<i64: 16, 128>}, {pipeline_mode = #tpu.pipeline_mode<synchronous>, transform_indices = @transform_2, window_bounds = array<i64: 128, 128>}, {pipeline_mode = #tpu.pipeline_mode<synchronous>, transform_indices = @transform_3, window_bounds = array<i64: 1, 128>}, {pipeline_mode = #tpu.pipeline_mode<synchronous>, transform_indices = @transform_4, window_bounds = array<i64: 128, 128>}, {pipeline_mode = #tpu.pipeline_mode<synchronous>, transform_indices = @transform_5, window_bounds = array<i64: 1, 128>}, {pipeline_mode = #tpu.pipeline_mode<synchronous>, transform_indices = @transform_6, window_bounds = array<i64: 128, 128>}, {pipeline_mode = #tpu.pipeline_mode<synchronous>, transform_indices = @transform_7, window_bounds = array<i64: 1, 128>}, {pipeline_mode = #tpu.pipeline_mode<synchronous>, transform_indices = @transform_8, window_bounds = array<i64: 128, 128>}, {pipeline_mode = #tpu.pipeline_mode<synchronous>, transform_indices = @transform_9, window_bounds = array<i64: 1, 128>}, {pipeline_mode = #tpu.pipeline_mode<synchronous>, transform_indices = @transform_10, window_bounds = array<i64: 128, 128>}, {pipeline_mode = #tpu.pipeline_mode<synchronous>, transform_indices = @transform_11, window_bounds = array<i64: 1, 128>}, {transform_indices = @transform_12, window_bounds = array<i64: 1, 16, 128>}, {transform_indices = @transform_13, window_bounds = array<i64: 1, 16, 128>}]} {
    %c0 = arith.constant 0 : index
    %c0_0 = arith.constant 0 : index
    %c0_1 = arith.constant 0 : index
    %0 = vector.load %arg1[%c0, %c0_0, %c0_1] : memref<1x16x16xbf16, #tpu.memory_space<vmem>>, vector<1x16x16xbf16>
    %1 = vector.shape_cast %0 : vector<1x16x16xbf16> to vector<16x16xbf16>
    %2 = arith.extf %1 : vector<16x16xbf16> to vector<16x16xf32>
    %c0_2 = arith.constant 0 : index
    %c0_3 = arith.constant 0 : index
    %3 = vector.load %arg2[%c0_2, %c0_3] : memref<16x128xf32, #tpu.memory_space<vmem>>, vector<16x128xf32>
    %cst = arith.constant dense<0.000000e+00> : vector<16x128xf32>
    %4 = tpu.matmul %2, %3, %cst {dimension_numbers = #tpu.dot_dimension_numbers<[1], [0], [0], [1], [0, 0, 1, 1], [], []>} : vector<16x16xf32>, vector<16x128xf32>, vector<16x128xf32> -> vector<16x128xf32>
    %5 = arith.addf %3, %4 : vector<16x128xf32>
    %c0_4 = arith.constant 0 : index
    %c0_5 = arith.constant 0 : index
    %6 = vector.load %arg3[%c0_4, %c0_5] : memref<128x128xf32, #tpu.memory_space<vmem>>, vector<128x128xf32>
    %cst_6 = arith.constant dense<0.000000e+00> : vector<16x128xf32>
    %7 = tpu.matmul %5, %6, %cst_6 {dimension_numbers = #tpu.dot_dimension_numbers<[1], [0], [0], [1], [0, 0, 1, 1], [], []>} : vector<16x128xf32>, vector<128x128xf32>, vector<16x128xf32> -> vector<16x128xf32>
    %c0_7 = arith.constant 0 : index
    %c0_8 = arith.constant 0 : index
    %8 = vector.load %arg4[%c0_7, %c0_8] : memref<1x128xf32, #tpu.memory_space<vmem>>, vector<1x128xf32>
    %9 = vector.broadcast %8 : vector<1x128xf32> to vector<16x128xf32>
    %10 = arith.addf %7, %9 : vector<16x128xf32>
    %cst_9 = arith.constant 0.000000e+00 : f32
    %11 = vector.broadcast %cst_9 : f32 to vector<16x128xf32>
    %12 = arith.maximumf %10, %11 : vector<16x128xf32>
    %c0_10 = arith.constant 0 : index
    %c0_11 = arith.constant 0 : index
    %13 = vector.load %arg5[%c0_10, %c0_11] : memref<128x128xf32, #tpu.memory_space<vmem>>, vector<128x128xf32>
    %cst_12 = arith.constant dense<0.000000e+00> : vector<16x128xf32>
    %14 = tpu.matmul %12, %13, %cst_12 {dimension_numbers = #tpu.dot_dimension_numbers<[1], [0], [0], [1], [0, 0, 1, 1], [], []>} : vector<16x128xf32>, vector<128x128xf32>, vector<16x128xf32> -> vector<16x128xf32>
    %c0_13 = arith.constant 0 : index
    %c0_14 = arith.constant 0 : index
    %15 = vector.load %arg6[%c0_13, %c0_14] : memref<1x128xf32, #tpu.memory_space<vmem>>, vector<1x128xf32>
    %16 = vector.broadcast %15 : vector<1x128xf32> to vector<16x128xf32>
    %17 = arith.addf %14, %16 : vector<16x128xf32>
    %cst_15 = arith.constant 0.000000e+00 : f32
    %18 = vector.broadcast %cst_15 : f32 to vector<16x128xf32>
    %19 = arith.maximumf %17, %18 : vector<16x128xf32>
    %cst_16 = arith.constant dense<0.000000e+00> : vector<16x128xf32>
    %20 = tpu.matmul %2, %19, %cst_16 {dimension_numbers = #tpu.dot_dimension_numbers<[1], [0], [0], [1], [0, 0, 1, 1], [], []>} : vector<16x16xf32>, vector<16x128xf32>, vector<16x128xf32> -> vector<16x128xf32>
    %21 = arith.addf %19, %20 : vector<16x128xf32>
    %c0_17 = arith.constant 0 : index
    %c0_18 = arith.constant 0 : index
    %22 = vector.load %arg7[%c0_17, %c0_18] : memref<128x128xf32, #tpu.memory_space<vmem>>, vector<128x128xf32>
    %cst_19 = arith.constant dense<0.000000e+00> : vector<16x128xf32>
    %23 = tpu.matmul %21, %22, %cst_19 {dimension_numbers = #tpu.dot_dimension_numbers<[1], [0], [0], [1], [0, 0, 1, 1], [], []>} : vector<16x128xf32>, vector<128x128xf32>, vector<16x128xf32> -> vector<16x128xf32>
    %c0_20 = arith.constant 0 : index
    %c0_21 = arith.constant 0 : index
    %24 = vector.load %arg8[%c0_20, %c0_21] : memref<1x128xf32, #tpu.memory_space<vmem>>, vector<1x128xf32>
    %25 = vector.broadcast %24 : vector<1x128xf32> to vector<16x128xf32>
    %26 = arith.addf %23, %25 : vector<16x128xf32>
    %cst_22 = arith.constant 0.000000e+00 : f32
    %27 = vector.broadcast %cst_22 : f32 to vector<16x128xf32>
    %28 = arith.maximumf %26, %27 : vector<16x128xf32>
    %c0_23 = arith.constant 0 : index
    %c0_24 = arith.constant 0 : index
    %29 = vector.load %arg9[%c0_23, %c0_24] : memref<128x128xf32, #tpu.memory_space<vmem>>, vector<128x128xf32>
    %cst_25 = arith.constant dense<0.000000e+00> : vector<16x128xf32>
    %30 = tpu.matmul %28, %29, %cst_25 {dimension_numbers = #tpu.dot_dimension_numbers<[1], [0], [0], [1], [0, 0, 1, 1], [], []>} : vector<16x128xf32>, vector<128x128xf32>, vector<16x128xf32> -> vector<16x128xf32>
    %c0_26 = arith.constant 0 : index
    %c0_27 = arith.constant 0 : index
    %31 = vector.load %arg10[%c0_26, %c0_27] : memref<1x128xf32, #tpu.memory_space<vmem>>, vector<1x128xf32>
    %32 = vector.broadcast %31 : vector<1x128xf32> to vector<16x128xf32>
    %33 = arith.addf %30, %32 : vector<16x128xf32>
    %c0_28 = arith.constant 0 : index
    %c0_29 = arith.constant 0 : index
    %c0_30 = arith.constant 0 : index
    %34 = vector.load %arg13[%c0_28, %c0_29, %c0_30] : memref<1x16x128xf32, #tpu.memory_space<vmem>>, vector<1x16x128xf32>
    %35 = vector.shape_cast %34 : vector<1x16x128xf32> to vector<16x128xf32>
    %36 = vector.shape_cast %33 : vector<16x128xf32> to vector<1x16x128xf32>
    tpu.vector_store %arg13[%c0_28, %c0_29, %c0_30], %36 {strides = array<i32>} : memref<1x16x128xf32, #tpu.memory_space<vmem>>, vector<1x16x128xf32>,
    %c0_31 = arith.constant 0 : index
    %c0_32 = arith.constant 0 : index
    %37 = vector.load %arg11[%c0_31, %c0_32] : memref<128x128xf32, #tpu.memory_space<vmem>>, vector<128x128xf32>
    %cst_33 = arith.constant dense<0.000000e+00> : vector<16x128xf32>
    %38 = tpu.matmul %33, %37, %cst_33 {dimension_numbers = #tpu.dot_dimension_numbers<[1], [0], [0], [1], [0, 0, 1, 1], [], []>} : vector<16x128xf32>, vector<128x128xf32>, vector<16x128xf32> -> vector<16x128xf32>
    %c0_34 = arith.constant 0 : index
    %c0_35 = arith.constant 0 : index
    %39 = vector.load %arg12[%c0_34, %c0_35] : memref<1x128xf32, #tpu.memory_space<vmem>>, vector<1x128xf32>
    %40 = vector.broadcast %39 : vector<1x128xf32> to vector<16x128xf32>
    %41 = arith.addf %38, %40 : vector<16x128xf32>
    %c0_36 = arith.constant 0 : index
    %c0_37 = arith.constant 0 : index
    %c0_38 = arith.constant 0 : index
    %42 = vector.load %arg14[%c0_36, %c0_37, %c0_38] : memref<1x16x128xf32, #tpu.memory_space<vmem>>, vector<1x16x128xf32>
    %43 = vector.shape_cast %42 : vector<1x16x128xf32> to vector<16x128xf32>
    %44 = vector.shape_cast %41 : vector<16x128xf32> to vector<1x16x128xf32>
    tpu.vector_store %arg14[%c0_36, %c0_37, %c0_38], %44 {strides = array<i32>} : memref<1x16x128xf32, #tpu.memory_space<vmem>>, vector<1x16x128xf32>,
    return
  }
  func.func @transform_0(%arg0: i32) -> (i32, i32, i32) {
    %c0_i32 = arith.constant 0 : i32
    %c0_i32_0 = arith.constant 0 : i32
    %c0_i32_1 = arith.constant 0 : i32
    return %arg0, %c0_i32, %c0_i32_0 : i32, i32, i32
  }
  func.func @transform_1(%arg0: i32) -> (i32, i32) {
    %c0_i32 = arith.constant 0 : i32
    %c0_i32_0 = arith.constant 0 : i32
    %c0_i32_1 = arith.constant 0 : i32
    return %c0_i32, %c0_i32_0 : i32, i32
  }
  func.func @transform_2(%arg0: i32) -> (i32, i32) {
    %c0_i32 = arith.constant 0 : i32
    %c0_i32_0 = arith.constant 0 : i32
    %c0_i32_1 = arith.constant 0 : i32
    return %c0_i32, %c0_i32_0 : i32, i32
  }
  func.func @transform_3(%arg0: i32) -> (i32, i32) {
    %c0_i32 = arith.constant 0 : i32
    %c0_i32_0 = arith.constant 0 : i32
    %c0_i32_1 = arith.constant 0 : i32
    return %c0_i32, %c0_i32_0 : i32, i32
  }
  func.func @transform_4(%arg0: i32) -> (i32, i32) {
    %c0_i32 = arith.constant 0 : i32
    %c0_i32_0 = arith.constant 0 : i32
    %c0_i32_1 = arith.constant 0 : i32
    return %c0_i32, %c0_i32_0 : i32, i32
  }
  func.func @transform_5(%arg0: i32) -> (i32, i32) {
    %c0_i32 = arith.constant 0 : i32
    %c0_i32_0 = arith.constant 0 : i32
    %c0_i32_1 = arith.constant 0 : i32
    return %c0_i32, %c0_i32_0 : i32, i32
  }
  func.func @transform_6(%arg0: i32) -> (i32, i32) {
    %c0_i32 = arith.constant 0 : i32
    %c0_i32_0 = arith.constant 0 : i32
    %c0_i32_1 = arith.constant 0 : i32
    return %c0_i32, %c0_i32_0 : i32, i32
  }
  func.func @transform_7(%arg0: i32) -> (i32, i32) {
    %c0_i32 = arith.constant 0 : i32
    %c0_i32_0 = arith.constant 0 : i32
    %c0_i32_1 = arith.constant 0 : i32
    return %c0_i32, %c0_i32_0 : i32, i32
  }
  func.func @transform_8(%arg0: i32) -> (i32, i32) {
    %c0_i32 = arith.constant 0 : i32
    %c0_i32_0 = arith.constant 0 : i32
    %c0_i32_1 = arith.constant 0 : i32
    return %c0_i32, %c0_i32_0 : i32, i32
  }
  func.func @transform_9(%arg0: i32) -> (i32, i32) {
    %c0_i32 = arith.constant 0 : i32
    %c0_i32_0 = arith.constant 0 : i32
    %c0_i32_1 = arith.constant 0 : i32
    return %c0_i32, %c0_i32_0 : i32, i32
  }
  func.func @transform_10(%arg0: i32) -> (i32, i32) {
    %c0_i32 = arith.constant 0 : i32
    %c0_i32_0 = arith.constant 0 : i32
    %c0_i32_1 = arith.constant 0 : i32
    return %c0_i32, %c0_i32_0 : i32, i32
  }
  func.func @transform_11(%arg0: i32) -> (i32, i32) {
    %c0_i32 = arith.constant 0 : i32
    %c0_i32_0 = arith.constant 0 : i32
    %c0_i32_1 = arith.constant 0 : i32
    return %c0_i32, %c0_i32_0 : i32, i32
  }
  func.func @transform_12(%arg0: i32) -> (i32, i32, i32) {
    %c0_i32 = arith.constant 0 : i32
    %c0_i32_0 = arith.constant 0 : i32
    %c0_i32_1 = arith.constant 0 : i32
    return %arg0, %c0_i32, %c0_i32_0 : i32, i32, i32
  }
  func.func @transform_13(%arg0: i32) -> (i32, i32, i32) {
    %c0_i32 = arith.constant 0 : i32
    %c0_i32_0 = arith.constant 0 : i32
    %c0_i32_1 = arith.constant 0 : i32
    return %arg0, %c0_i32, %c0_i32_0 : i32, i32, i32
  }
}

</mosaic_0001>

<bundles_post_ra>
// kernel: tpu_custom_call.1
= control target key start
LH: loop header
LB: loop body
LE: loop exit
PB: predicated region body
PF: predicated region fallthrough
CT: control target
= control target key end

     0   :  { %s3274_s0 = inlined_call_operand.hbm [shape: bf16[2,16,16], index: 0, kind: input, shape index: {}]   ;;  %s3275_s1 = inlined_call_operand.hbm [shape: f32[16,128], index: 1, kind: input, shape index: {}]   ;;  %s3276_s2 = inlined_call_operand.hbm [shape: f32[128,128], index: 2, kind: input, shape index: {}]   ;;  %s3277_s3 = inlined_call_operand.hbm [shape: f32[1,128], index: 3, kind: input, shape index: {}]   ;;  %s3278_s4 = inlined_call_operand.hbm [shape: f32[128,128], index: 4, kind: input, shape index: {}]   ;;  %s3279_s5 = inlined_call_operand.hbm [shape: f32[1,128], index: 5, kind: input, shape index: {}]   ;;  %s3280_s6 = inlined_call_operand.hbm [shape: f32[128,128], index: 6, kind: input, shape index: {}]   ;;  %s3281_s7 = inlined_call_operand.hbm [shape: f32[1,128], index: 7, kind: input, shape index: {}]   ;;  %s3282_s8 = inlined_call_operand.hbm [shape: f32[128,128], index: 8, kind: input, shape index: {}]   ;;  %s3283_s9 = inlined_call_operand.hbm [shape: f32[1,128], index: 9, kind: input, shape index: {}]   ;;  %s3284_s10 = inlined_call_operand.hbm [shape: f32[128,128], index: 10, kind: input, shape index: {}]   ;;  %s3285_s11 = inlined_call_operand.hbm [shape: f32[1,128], index: 11, kind: input, shape index: {}]   ;;  %s3286_s12 = inlined_call_operand.hbm [shape: f32[2,16,128], index: 12, kind: output, shape index: {0}]   ;;  %s3287_s13 = inlined_call_operand.hbm [shape: f32[2,16,128], index: 13, kind: output, shape index: {1}]  }
   0x1   :  { %3303 = sst [smem:[#allocation36_spill]] %s3274_s0 }
   0x2   :  { %3304 = sst [smem:[#allocation37_spill]] %s3275_s1 }
   0x3   :  { %3305 = sst [smem:[#allocation38_spill]] %s3276_s2 }
   0x4   :  { %3306 = sst [smem:[#allocation39_spill]] %s3277_s3 }
   0x5   :  { %3307 = sst [smem:[#allocation40_spill]] %s3278_s4 }
   0x6   :  { %3308 = sst [smem:[#allocation41_spill]] %s3279_s5 }
   0x7   :  { %3309 = sst [smem:[#allocation42_spill]] %s3286_s12 }
   0x8   :  { %3310 = sst [smem:[#allocation43_spill]] %s3287_s13 }
   0x9   :  { %19 = vsyncpa [#allocation3], 0 }
   0xa   :  { %21 = vsyncpa [#allocation3 + $0x1], 0 }
   0xb   :  { %22 = vsyncpa [#allocation6], 0 }
   0xc   :  { %23 = vsyncpa [#allocation9], 0 }
   0xd   :  { %24 = vsyncpa [#allocation12], 0 }
   0xe   :  { %25 = vsyncpa [#allocation15], 0 }
   0xf   :  { %26 = vsyncpa [#allocation18], 0 }
  0x10   :  { %27 = vsyncpa [#allocation21], 0 }
  0x11   :  { %28 = vsyncpa [#allocation4], 0 }
  0x12   :  { %30 = vsyncpa [#allocation4 + $0x1], 0 }
  0x13   :  { %31 = vsyncpa [#allocation24], 0 }
  0x14   :  { %33 = vsyncpa [#allocation24 + $0x1], 0  ;;  %s2763_s25 = smov 0   ;;  %s2765_s26 = smov 0  }
  0x15   :  { %s2767_s27 = smov 0   ;;  %s2769_s28 = smov 0  }
  0x16 LB: > { %s2673_s29 = smov [#allocation5]   ;;  %s2784_s14 = sadd.s32 4294967295, %s2671_s28   ;;  %s2671_s28 = sphi %s2769_s28, %s3356_s28   ;;  %s2667_s27 = sphi %s2767_s27, %s3355_s27   ;;  %s2663_s26 = sphi %s2765_s26, %s3354_s26   ;;  %s2659_s25 = sphi %s2763_s25, %s3353_s25  }
  0x17   : > { %s365_s30 = sshll.u32 %s2673_s29, 4  ;;  %3311 = sst [smem:[#allocation34_spill]] %s2784_s14  ;;  %s2789_s30 = int_to_ptr.vmem [resolvable:$true] %s365_s30 }
  0x18   : > { %p1533_p0 = scmp.ge.s32.totalorder %s2671_s28, 1  ;;  %p3297_p1 = scmp.eq.s32.totalorder %s2784_s14, 0 }
  0x19   : > { %p353_p2 = scmp.lt.s32.totalorder %s2671_s28, 3  ;;  %s2674_s16 = smov [#allocation8]  }
  0x1a   : > { %s392_s17 = sshll.u32 %s2674_s16, 4  ;;  %s2675_s19 = smov [#allocation11]   ;;  %s2804_s17 = int_to_ptr.vmem [resolvable:$true] %s392_s17 }
  0x1b   : > { %p2791_p3 = pnand %p1533_p0, %p353_p2  ;;  %s416_s20 = sshll.u32 %s2675_s19, 4  ;;  %s2806_s20 = int_to_ptr.vmem [resolvable:$true] %s416_s20 }
  0x1c   : > { %s3315_s1 = sld [smem:[#allocation37_spill]] }
  0x1d   : > { %s3312_s15 = scalar_select %p2791_p3, 1, 0 }
  0x1e   : > { %p2093_p5 = pneg %p2791_p3 }
  0x1f   : > { %3313 = sst [smem:[#allocation35_spill]] %s3312_s15 }
  0x20   : > { %p2800_p6 = pnand %p2093_p5, %p3297_p1 }
  0x22   : > { %s2211_s23 = scalar_lea.hbm %s3315_s1, 256  ;;  %p2816_p8 = pneg %p2800_p6 }
  0x23   : > { %p2212_p7 = scmp.ne.s32.totalorder %s3315_s1, %s2211_s23  ;;  %p2218_p11 = scmp.lt.u32.totalorder %s2211_s23, %s3315_s1 }
  0x25   : > { %p2214_p9 = pnand %p2816_p8, %p2212_p7 }
  0x27   : > { %p2215_p10 = pneg %p2214_p9 }
  0x29   : > { %p2220_p12 = pnand %p2218_p11, %p2215_p10 }
  0x2b   : > { %2223 = shalt.err (!%p2220_p12)
}
  0x2c   : > { %s2224_s21 = scalar_lea.vmem %s2789_s30, 256  ;;  %p2232_p5 = scmp.lt.s32.totalorder %s2789_s30, %s2789_s30 }
  0x2d   : > { %p2225_p13 = scmp.ne.s32.totalorder %s2789_s30, %s2224_s21  ;;  %p2233_p4 = scmp.lt.s32.totalorder %s2224_s21, %s2224_s21 }
  0x2f   : > { %p2227_p0 = pnand %p2225_p13, %p2816_p8  ;;  %p2234_p7 = por %p2233_p4, %p2232_p5 }
  0x31   : > { %p2228_p2 = pneg %p2227_p0 }
  0x33   : > { %p2235_p9 = pnand %p2234_p7, %p2228_p2 }
  0x35   : > { %2238 = shalt.err (!%p2235_p9)
}
  0x36   : > { %s3295_s22 = smov 128   ;;  %s2677_s13 = smov 8  }
  0x37   : > { %2096 = dma.hbm_to_vmem [thread:$0]  (!%p2800_p6), %s3315_s1, 256, %s2789_s30, [#allocation6], %s3295_s22, %s3295_s22, %s2677_s13  }
  0x38   : > { %s3317_s3 = sld [smem:[#allocation39_spill]] }
  0x3e   : > { %s2239_s21 = scalar_lea.hbm %s3317_s3, 16 }
  0x3f   : > { %p2240_p4 = scmp.ne.s32.totalorder %s3317_s3, %s2239_s21  ;;  %p2246_p12 = scmp.lt.u32.totalorder %s2239_s21, %s3317_s3 }
  0x41   : > { %p2242_p10 = pnand %p2240_p4, %p2816_p8 }
  0x43   : > { %p2243_p11 = pneg %p2242_p10 }
  0x45   : > { %p2248_p13 = pnand %p2246_p12, %p2243_p11 }
  0x47   : > { %2251 = shalt.err (!%p2248_p13)
}
  0x48   : > { %s2252_s30 = scalar_lea.vmem %s2804_s17, 16  ;;  %s2259_s12 = scalar_lea.vmem %s2804_s17, 32 }
  0x49   : > { %p2253_p0 = scmp.ne.s32.totalorder %s2804_s17, %s2252_s30  ;;  %p2260_p7 = scmp.lt.s32.totalorder %s2804_s17, %s2804_s17 }
  0x4a   : > { %p2261_p9 = scmp.lt.s32.totalorder %s2259_s12, %s2252_s30 }
  0x4b   : > { %p2255_p2 = pnand %p2253_p0, %p2816_p8 }
  0x4c   : > { %p2262_p4 = por %p2261_p9, %p2260_p7 }
  0x4d   : > { %p2256_p5 = pneg %p2255_p2 }
  0x4f   : > { %p2263_p10 = pnand %p2262_p4, %p2256_p5 }
  0x51   : > { %2266 = shalt.err (!%p2263_p10)
}
  0x52   : > { %2102 = dma.hbm_to_vmem [thread:$0]  (!%p2800_p6), %s3317_s3, 16, %s2804_s17, [#allocation9]  }
  0x53   : > { %s3318_s5 = sld [smem:[#allocation41_spill]] }
  0x59   : > { %s2267_s24 = scalar_lea.hbm %s3318_s5, 16 }
  0x5a   : > { %p2268_p11 = scmp.ne.s32.totalorder %s3318_s5, %s2267_s24  ;;  %p2274_p0 = scmp.lt.u32.totalorder %s2267_s24, %s3318_s5 }
  0x5c   : > { %p2270_p12 = pnand %p2268_p11, %p2816_p8 }
  0x5e   : > { %p2271_p13 = pneg %p2270_p12 }
  0x60   : > { %p2276_p2 = pnand %p2274_p0, %p2271_p13 }
  0x62   : > { %2279 = shalt.err (!%p2276_p2)
}
  0x63   : > { %s2280_s17 = scalar_lea.vmem %s2806_s20, 16  ;;  %s2287_s12 = scalar_lea.vmem %s2806_s20, 32 }
  0x64   : > { %p2281_p5 = scmp.ne.s32.totalorder %s2806_s20, %s2280_s17  ;;  %p2288_p4 = scmp.lt.s32.totalorder %s2806_s20, %s2806_s20 }
  0x65   : > { %p2289_p10 = scmp.lt.s32.totalorder %s2287_s12, %s2280_s17 }
  0x66   : > { %p2283_p7 = pnand %p2281_p5, %p2816_p8 }
  0x67   : > { %p2290_p11 = por %p2289_p10, %p2288_p4 }
  0x68   : > { %p2284_p9 = pneg %p2283_p7 }
  0x6a   : > { %p2291_p12 = pnand %p2290_p11, %p2284_p9 }
  0x6c   : > { %2294 = shalt.err (!%p2291_p12)
}
  0x6d   : > { %2108 = dma.hbm_to_vmem [thread:$0]  (!%p2800_p6), %s3318_s5, 16, %s2806_s20, [#allocation12]  }
  0x6e   : > { %s2678_s15 = smov [#allocation14]   ;;  %s2679_s24 = smov [#allocation17]  }
  0x6f   : > { %s440_s23 = sshll.u32 %s2678_s15, 4  ;;  %s464_s29 = sshll.u32 %s2679_s24, 4  ;;  %s441_s23 = int_to_ptr.vmem [resolvable:$true] %s440_s23  ;;  %s465_s29 = int_to_ptr.vmem [resolvable:$true] %s464_s29 }
  0x70   : > { %s2295_s30 = scalar_lea.hbm %s3281_s7, 16 }
  0x71   : > { %p2296_p13 = scmp.ne.s32.totalorder %s3281_s7, %s2295_s30  ;;  %p2302_p5 = scmp.lt.u32.totalorder %s2295_s30, %s3281_s7 }
  0x73   : > { %p2298_p0 = pnand %p2296_p13, %p2816_p8 }
  0x75   : > { %p2299_p2 = pneg %p2298_p0 }
  0x77   : > { %p2304_p7 = pnand %p2302_p5, %p2299_p2 }
  0x79   : > { %2307 = shalt.err (!%p2304_p7)
}
  0x7a   : > { %s2308_s20 = scalar_lea.vmem %s441_s23, 16  ;;  %s2315_s14 = scalar_lea.vmem %s441_s23, 32 }
  0x7b   : > { %p2309_p9 = scmp.ne.s32.totalorder %s441_s23, %s2308_s20  ;;  %p2316_p11 = scmp.lt.s32.totalorder %s441_s23, %s441_s23 }
  0x7c   : > { %p2317_p12 = scmp.lt.s32.totalorder %s2315_s14, %s2308_s20 }
  0x7d   : > { %p2311_p4 = pnand %p2309_p9, %p2816_p8 }
  0x7e   : > { %p2318_p1 = por %p2317_p12, %p2316_p11 }
  0x7f   : > { %p2312_p10 = pneg %p2311_p4 }
  0x81   : > { %p2319_p3 = pnand %p2318_p1, %p2312_p10 }
  0x83   : > { %2322 = shalt.err (!%p2319_p3)
}
  0x84   : > { %2114 = dma.hbm_to_vmem [thread:$0]  (!%p2800_p6), %s3281_s7, 16, %s441_s23, [#allocation15]  }
  0x85   : > { %s2323_s21 = scalar_lea.hbm %s3283_s9, 16 }
  0x86   : > { %p2324_p13 = scmp.ne.s32.totalorder %s3283_s9, %s2323_s21  ;;  %p2330_p3 = scmp.lt.u32.totalorder %s2323_s21, %s3283_s9 }
  0x88   : > { %p2326_p0 = pnand %p2324_p13, %p2816_p8 }
  0x8a   : > { %p2327_p1 = pneg %p2326_p0 }
  0x8c   : > { %p2332_p2 = pnand %p2330_p3, %p2327_p1 }
  0x8e   : > { %2335 = shalt.err (!%p2332_p2)
}
  0x8f   : > { %s2336_s20 = scalar_lea.vmem %s465_s29, 16  ;;  %s2343_s23 = scalar_lea.vmem %s465_s29, 32 }
  0x90   : > { %p2337_p5 = scmp.ne.s32.totalorder %s465_s29, %s2336_s20  ;;  %p2344_p4 = scmp.lt.s32.totalorder %s465_s29, %s465_s29 }
  0x91   : > { %p2345_p10 = scmp.lt.s32.totalorder %s2343_s23, %s2336_s20 }
  0x92   : > { %p2339_p7 = pnand %p2337_p5, %p2816_p8 }
  0x93   : > { %p2346_p11 = por %p2345_p10, %p2344_p4 }
  0x94   : > { %p2340_p9 = pneg %p2339_p7 }
  0x96   : > { %p2347_p12 = pnand %p2346_p11, %p2340_p9 }
  0x98   : > { %2350 = shalt.err (!%p2347_p12)
}
  0x99   : > { %2120 = dma.hbm_to_vmem [thread:$0]  (!%p2800_p6), %s3283_s9, 16, %s465_s29, [#allocation18]  }
  0x9a   : > { %s2680_s24 = smov [#allocation7]   ;;  %s2681_s19 = smov [#allocation10]  }
  0x9b   : > { %s378_s22 = sshll.u32 %s2680_s24, 4  ;;  %s402_s21 = sshll.u32 %s2681_s19, 4  ;;  %s379_s22 = int_to_ptr.vmem [resolvable:$true] %s378_s22  ;;  %s403_s21 = int_to_ptr.vmem [resolvable:$true] %s402_s21 }
  0x9c   : > { %s3319_s2 = sld [smem:[#allocation38_spill]] }
  0xa2   : > { %s2351_s12 = scalar_lea.hbm %s3319_s2, 2048 }
  0xa3   : > { %p2352_p13 = scmp.ne.s32.totalorder %s3319_s2, %s2351_s12  ;;  %p2358_p3 = scmp.lt.u32.totalorder %s2351_s12, %s3319_s2 }
  0xa5   : > { %p2354_p0 = pnand %p2352_p13, %p2816_p8 }
  0xa7   : > { %p2355_p1 = pneg %p2354_p0 }
  0xa9   : > { %p2360_p2 = pnand %p2358_p3, %p2355_p1 }
  0xab   : > { %2363 = shalt.err (!%p2360_p2)
}
  0xac   : > { %s2364_s29 = scalar_lea.vmem %s379_s22, 2048  ;;  %p2372_p4 = scmp.lt.s32.totalorder %s379_s22, %s379_s22 }
  0xad   : > { %p2365_p5 = scmp.ne.s32.totalorder %s379_s22, %s2364_s29  ;;  %p2373_p10 = scmp.lt.s32.totalorder %s2364_s29, %s2364_s29 }
  0xaf   : > { %p2367_p7 = pnand %p2365_p5, %p2816_p8  ;;  %p2374_p11 = por %p2373_p10, %p2372_p4 }
  0xb1   : > { %p2368_p9 = pneg %p2367_p7 }
  0xb3   : > { %p2375_p12 = pnand %p2374_p11, %p2368_p9 }
  0xb5   : > { %2378 = shalt.err (!%p2375_p12)
}
  0xb6   : > { %s3320_s15 = smov 128   ;;  %s3321_s4 = sld [smem:[#allocation40_spill]] }
  0xb7   : > { %2099 = dma.hbm_to_vmem [thread:$0]  (!%p2800_p6), %s3319_s2, 2048, %s379_s22, [#allocation6], %s3320_s15, %s3320_s15, %s2677_s13  }
  0xbc   : > { %s2379_s12 = scalar_lea.hbm %s3321_s4, 2048 }
  0xbd   : > { %p2380_p13 = scmp.ne.s32.totalorder %s3321_s4, %s2379_s12  ;;  %p2386_p3 = scmp.lt.u32.totalorder %s2379_s12, %s3321_s4 }
  0xbf   : > { %p2382_p0 = pnand %p2380_p13, %p2816_p8 }
  0xc1   : > { %p2383_p1 = pneg %p2382_p0 }
  0xc3   : > { %p2388_p2 = pnand %p2386_p3, %p2383_p1 }
  0xc5   : > { %2391 = shalt.err (!%p2388_p2)
}
  0xc6   : > { %s2392_s29 = scalar_lea.vmem %s403_s21, 2048  ;;  %p2400_p4 = scmp.lt.s32.totalorder %s403_s21, %s403_s21 }
  0xc7   : > { %p2393_p5 = scmp.ne.s32.totalorder %s403_s21, %s2392_s29  ;;  %p2401_p10 = scmp.lt.s32.totalorder %s2392_s29, %s2392_s29 }
  0xc9   : > { %p2395_p7 = pnand %p2393_p5, %p2816_p8  ;;  %p2402_p11 = por %p2401_p10, %p2400_p4 }
  0xcb   : > { %p2396_p9 = pneg %p2395_p7 }
  0xcd   : > { %p2403_p12 = pnand %p2402_p11, %p2396_p9 }
  0xcf   : > { %2406 = shalt.err (!%p2403_p12)
}
  0xd0   : > { %2105 = dma.hbm_to_vmem [thread:$0]  (!%p2800_p6), %s3321_s4, 2048, %s403_s21, [#allocation9], %s3320_s15, %s3320_s15, %s2677_s13  }
  0xd1   : > { %s2682_s19 = smov [#allocation13]   ;;  %s2683_s17 = smov [#allocation16]  }
  0xd2   : > { %s426_s30 = sshll.u32 %s2682_s19, 4  ;;  %s450_s12 = sshll.u32 %s2683_s17, 4  ;;  %s427_s30 = int_to_ptr.vmem [resolvable:$true] %s426_s30  ;;  %s451_s12 = int_to_ptr.vmem [resolvable:$true] %s450_s12 }
  0xd3   : > { %s2407_s23 = scalar_lea.hbm %s3280_s6, 2048 }
  0xd4   : > { %p2408_p13 = scmp.ne.s32.totalorder %s3280_s6, %s2407_s23  ;;  %p2414_p3 = scmp.lt.u32.totalorder %s2407_s23, %s3280_s6 }
  0xd6   : > { %p2410_p0 = pnand %p2408_p13, %p2816_p8 }
  0xd8   : > { %p2411_p1 = pneg %p2410_p0 }
  0xda   : > { %p2416_p2 = pnand %p2414_p3, %p2411_p1 }
  0xdc   : > { %2419 = shalt.err (!%p2416_p2)
}
  0xdd   : > { %s2420_s21 = scalar_lea.vmem %s427_s30, 2048  ;;  %p2428_p4 = scmp.lt.s32.totalorder %s427_s30, %s427_s30 }
  0xde   : > { %p2421_p5 = scmp.ne.s32.totalorder %s427_s30, %s2420_s21  ;;  %p2429_p10 = scmp.lt.s32.totalorder %s2420_s21, %s2420_s21 }
  0xe0   : > { %p2423_p7 = pnand %p2421_p5, %p2816_p8  ;;  %p2430_p11 = por %p2429_p10, %p2428_p4 }
  0xe2   : > { %p2424_p9 = pneg %p2423_p7 }
  0xe4   : > { %p2431_p12 = pnand %p2430_p11, %p2424_p9 }
  0xe6   : > { %2434 = shalt.err (!%p2431_p12)
}
  0xe7   : > { %2111 = dma.hbm_to_vmem [thread:$0]  (!%p2800_p6), %s3280_s6, 2048, %s427_s30, [#allocation12], %s3320_s15, %s3320_s15, %s2677_s13  }
  0xe8   : > { %s2435_s0 = scalar_lea.hbm %s3282_s8, 2048 }
  0xe9   : > { %p2436_p13 = scmp.ne.s32.totalorder %s3282_s8, %s2435_s0  ;;  %p2442_p3 = scmp.lt.u32.totalorder %s2435_s0, %s3282_s8 }
  0xeb   : > { %p2438_p0 = pnand %p2436_p13, %p2816_p8 }
  0xed   : > { %p2439_p1 = pneg %p2438_p0 }
  0xef   : > { %p2444_p2 = pnand %p2442_p3, %p2439_p1 }
  0xf1   : > { %2447 = shalt.err (!%p2444_p2)
}
  0xf2   : > { %s2448_s22 = scalar_lea.vmem %s451_s12, 2048  ;;  %p2456_p4 = scmp.lt.s32.totalorder %s451_s12, %s451_s12 }
  0xf3   : > { %p2449_p5 = scmp.ne.s32.totalorder %s451_s12, %s2448_s22  ;;  %p2457_p10 = scmp.lt.s32.totalorder %s2448_s22, %s2448_s22 }
  0xf5   : > { %p2451_p7 = pnand %p2449_p5, %p2816_p8  ;;  %p2458_p11 = por %p2457_p10, %p2456_p4 }
  0xf7   : > { %p2452_p9 = pneg %p2451_p7 }
  0xf9   : > { %p2459_p12 = pnand %p2458_p11, %p2452_p9 }
  0xfb   : > { %2462 = shalt.err (!%p2459_p12)
}
  0xfc   : > { %2117 = dma.hbm_to_vmem [thread:$0]  (!%p2800_p6), %s3282_s8, 2048, %s451_s12, [#allocation15], %s3320_s15, %s3320_s15, %s2677_s13  }
  0xfd   : > { %s2684_s1 = smov [#allocation19]   ;;  %s2685_s19 = smov [#allocation20]  }
  0xfe   : > { %s474_s24 = sshll.u32 %s2684_s1, 4  ;;  %s488_s17 = sshll.u32 %s2685_s19, 4  ;;  %s475_s24 = int_to_ptr.vmem [resolvable:$true] %s474_s24  ;;  %s489_s17 = int_to_ptr.vmem [resolvable:$true] %s488_s17 }
  0xff   : > { %s2463_s23 = scalar_lea.hbm %s3284_s10, 2048 }
 0x100   : > { %p2464_p13 = scmp.ne.s32.totalorder %s3284_s10, %s2463_s23  ;;  %p2470_p3 = scmp.lt.u32.totalorder %s2463_s23, %s3284_s10 }
 0x102   : > { %p2466_p0 = pnand %p2464_p13, %p2816_p8 }
 0x104   : > { %p2467_p1 = pneg %p2466_p0 }
 0x106   : > { %p2472_p2 = pnand %p2470_p3, %p2467_p1 }
 0x108   : > { %2475 = shalt.err (!%p2472_p2)
}
 0x109   : > { %s2476_s12 = scalar_lea.vmem %s475_s24, 2048  ;;  %p2484_p4 = scmp.lt.s32.totalorder %s475_s24, %s475_s24 }
 0x10a   : > { %p2477_p5 = scmp.ne.s32.totalorder %s475_s24, %s2476_s12  ;;  %p2485_p10 = scmp.lt.s32.totalorder %s2476_s12, %s2476_s12 }
 0x10c   : > { %p2479_p7 = pnand %p2477_p5, %p2816_p8  ;;  %p2486_p11 = por %p2485_p10, %p2484_p4 }
 0x10e   : > { %p2480_p9 = pneg %p2479_p7 }
 0x110   : > { %p2487_p12 = pnand %p2486_p11, %p2480_p9 }
 0x112   : > { %2490 = shalt.err (!%p2487_p12)
}
 0x113   : > { %2123 = dma.hbm_to_vmem [thread:$0]  (!%p2800_p6), %s3284_s10, 2048, %s475_s24, [#allocation18], %s3320_s15, %s3320_s15, %s2677_s13  }
 0x114   : > { %s2491_s20 = scalar_lea.hbm %s3285_s11, 16 }
 0x115   : > { %p2492_p13 = scmp.ne.s32.totalorder %s3285_s11, %s2491_s20  ;;  %p2498_p3 = scmp.lt.u32.totalorder %s2491_s20, %s3285_s11 }
 0x117   : > { %p2494_p0 = pnand %p2492_p13, %p2816_p8 }
 0x119   : > { %p2495_p1 = pneg %p2494_p0 }
 0x11b   : > { %p2500_p2 = pnand %p2498_p3, %p2495_p1 }
 0x11d   : > { %2503 = shalt.err (!%p2500_p2)
}
 0x11e   : > { %s2504_s30 = scalar_lea.vmem %s489_s17, 16  ;;  %s2511_s13 = scalar_lea.vmem %s489_s17, 32 }
 0x11f   : > { %p2505_p5 = scmp.ne.s32.totalorder %s489_s17, %s2504_s30  ;;  %p2512_p4 = scmp.lt.s32.totalorder %s489_s17, %s489_s17 }
 0x120   : > { %p2513_p10 = scmp.lt.s32.totalorder %s2511_s13, %s2504_s30 }
 0x121   : > { %p2507_p7 = pnand %p2505_p5, %p2816_p8 }
 0x122   : > { %p2514_p11 = por %p2513_p10, %p2512_p4 }
 0x123   : > { %p2508_p9 = pneg %p2507_p7 }
 0x125   : > { %p2515_p12 = pnand %p2514_p11, %p2508_p9 }
 0x127   : > { %2518 = shalt.err (!%p2515_p12)
}
 0x128   : > { %s3322_s16 = sld [smem:[#allocation34_spill]]  ;;  %s1532_s12 = sadd.s32 4294967294, %s2671_s28  }
 0x129   : > { %2126 = dma.hbm_to_vmem [thread:$0]  (!%p2800_p6), %s3285_s11, 16, %s489_s17, [#allocation21]  }
 0x12a   : > { %s3049_s18 = sadd.s32 1, %s2671_s28   ;;  %s46_s21 = sadd.s32 1, %s2667_s27 }
 0x12b   : > { %s43_s1 = ssub.s32 %s2671_s28, %s3049_s18  ;;  %p53_p8 = scmp.ne.s32.totalorder %s2667_s27, %s2663_s26 }
 0x12c   : > { %p44_p13 = scmp.eq.s32.totalorder %s43_s1, 0  ;;  %p54_p0 = scmp.eq.s32.totalorder %s2671_s28, 0 }
 0x12d   : > { %p59_p1 = scmp.ne.s32.totalorder %s2663_s26, %s2659_s25  ;;  %p320_p9 = scmp.eq.s32.totalorder %s1532_s12, 1 }
 0x12e   : > { %p314_p3 = scmp.eq.s32.totalorder %s3322_s16, 1  ;;  %p55_p2 = por %p54_p0, %p53_p8 }
 0x12f   : > { %s3061_s19 = scalar_select %p44_p13, %s2667_s27, %s46_s21  }
 0x130   : > { %p3323_p5 = scmp.eq.s32.totalorder %s3322_s16, 0  ;;  %p3069_p6 = por %p314_p3, %p53_p8 }
 0x131   : > { %p2149_p4 = scmp.lt.s32.totalorder %s2671_s28, 2  ;;  %s499_s20 = sand.u32 1, %s2667_s27  }
 0x132   : > { %p3065_p7 = por %p3323_p5, %p59_p1  ;;  %p3075_p10 = por %p320_p9, %p59_p1 }
 0x133   : > { %s3325_s17 = scalar_select %p3069_p6, 1, 0 }
 0x134   : > { %s3326_s23 = scalar_select %p3075_p10, 1, 0 }
 0x135   : > { %s1546_s14 = sshll.u32 %s499_s20, 3  ;;  %s1581_s29 = sshll.u32 %s2671_s28, 7 }
 0x136   : > { %s3327_s13 = sld [smem:[#allocation36_spill]]  ;;  %s503_s24 = scalar_lea.vmem [#allocation2], %s1546_s14 }
 0x137   : > { %s510_s16 = sshll.u32 %s503_s24, 4  ;;  %p3085_p11 = pnand %p2149_p4, %p55_p2  ;;  %s3089_s16 = int_to_ptr.vmem [resolvable:$true] %s510_s16 }
 0x138   : > { %s3091_s21 = scalar_lea.sflag [#allocation3], %s499_s20 }
 0x139   : > { %p2521_p8 = pneg %p3085_p11 }
 0x13c   : > { %s3083_s15 = scalar_lea.hbm %s3327_s13, %s1581_s29  ;;  %s2524_s22 = scalar_lea.hbm %s3327_s13, 256 }
 0x13d   : > { %s2519_s1 = scalar_lea.hbm %s3083_s15, 128  ;;  %p2525_p1 = scmp.lt.u32.totalorder %s3083_s15, %s3327_s13 }
 0x13e   : > { %p2520_p12 = scmp.ne.s32.totalorder %s3083_s15, %s2519_s1  ;;  %p2526_p3 = scmp.lt.u32.totalorder %s2524_s22, %s2519_s1 }
 0x13f   : > { %p2528_p5 = scmp.lt.u32.totalorder %s2519_s1, %s3083_s15 }
 0x140   : > { %p2522_p13 = pnand %p2521_p8, %p2520_p12  ;;  %p2527_p2 = por %p2526_p3, %p2525_p1 }
 0x142   : > { %p2523_p0 = pneg %p2522_p13  ;;  %p2529_p9 = por %p2528_p5, %p2527_p2 }
 0x144   : > { %p2530_p4 = pnand %p2529_p9, %p2523_p0 }
 0x146   : > { %2533 = shalt.err (!%p2530_p4)
}
 0x147   : > { %s2534_s20 = scalar_lea.vmem %s3089_s16, 128  ;;  %s2686_s14 = smov [#allocation2]  }
 0x148   : > { %p2535_p12 = scmp.ne.s32.totalorder %s3089_s16, %s2534_s20  ;;  %s2539_s29 = sshll.u32 %s2686_s14, 4  ;;  %s2540_s29 = int_to_ptr.vmem [resolvable:$false] %s2539_s29 }
 0x149   : > { %s2541_s30 = scalar_lea.vmem %s2540_s29, 256  ;;  %p2542_p6 = scmp.lt.s32.totalorder %s3089_s16, %s2540_s29 }
 0x14a   : > { %p2537_p13 = pnand %p2535_p12, %p2521_p8  ;;  %p2543_p1 = scmp.lt.s32.totalorder %s2541_s30, %s2534_s20 }
 0x14c   : > { %p2538_p10 = pneg %p2537_p13  ;;  %p2544_p3 = por %p2543_p1, %p2542_p6 }
 0x14e   : > { %p2545_p2 = pnand %p2544_p3, %p2538_p10 }
 0x150   : > { %2548 = shalt.err (!%p2545_p2)
}
 0x151   : > { %s2687_s1 = smov 64   ;;  %s2688_s22 = smov 4  }
 0x152   : > { %2130 = dma.hbm_to_vmem [thread:$0]  (!%p3085_p11), %s3083_s15, 128, %s3089_s16, %s3091_s21, %s2687_s1, %s2687_s1, %s2688_s22  }
 0x153   : > { %s3329_s24 = sld [smem:[#allocation35_spill]] }
 0x159   : > { %p3330_p8 = scmp.ne.s32.totalorder %s3329_s24, 0 }
 0x15a   : > { %s3122_s14 = sand.u32 (!%p3330_p8), 1, %s2663_s26  }
 0x15b   : > { %522 = sbr.rel (%p3330_p8) target bundleno = 1924 (0x784), region = 68  ;;  %s1550_s20 = sshll.u32 (!%p3330_p8), %s3122_s14, 3 }
 0x15c   : > { %s525_s29 = scalar_lea.sflag (!%p3330_p8), [#allocation3], %s3122_s14  ;;  %s528_s30 = scalar_lea.vmem (!%p3330_p8), [#allocation2], %s1550_s20 }
 0x162   : > { %2622 = dma.done.wait (%p3065_p7), %s525_s29, 128  }
 0x163   : > { %2624 = vsyncadd (%p3065_p7), %s525_s29, 4294967168  ;;  %s3331_s2 = sld [smem:[#allocation34_spill]] }
 0x169   : > { %p3332_p6 = scmp.eq.s32.totalorder %s3331_s2, 0 }
 0x16b   : > { %2626 = dma.done.wait (%p3332_p6), [#allocation6], 2304   ;;  %p3333_p10 = pmov %p3332_p6 }
 0x16c   : > { %p3334_p11 = pmov %p3332_p6 }
 0x16d   : > { %2628 = vsyncadd (%p3333_p10), [#allocation6], 4294964992 }
 0x16e   : > { %2630 = dma.done.wait (%p3334_p11), [#allocation9], 2064   ;;  %p3335_p0 = pmov %p3332_p6 }
 0x170   : > { %2632 = vsyncadd (%p3335_p0), [#allocation9], 4294965232  ;;  %p3336_p5 = pmov %p3335_p0 }
 0x171   : > { %p3337_p9 = pmov %p3335_p0 }
 0x172   : > { %2634 = dma.done.wait (%p3336_p5), [#allocation12], 2064  }
 0x173   : > { %2636 = vsyncadd (%p3337_p9), [#allocation12], 4294965232  ;;  %p3338_p7 = pmov %p3335_p0 }
 0x174   : > { %p3339_p4 = pmov %p3335_p0 }
 0x175   : > { %2638 = dma.done.wait (%p3338_p7), [#allocation15], 2064  }
 0x176   : > { %2640 = vsyncadd (%p3339_p4), [#allocation15], 4294965232  ;;  %p3340_p12 = pmov %p3335_p0 }
 0x177   : > { %p3341_p13 = pmov %p3335_p0 }
 0x178   : > { %2642 = dma.done.wait (%p3340_p12), [#allocation18], 2064  }
 0x179   : > { %2644 = vsyncadd (%p3341_p13), [#allocation18], 4294965232  ;;  %p3342_p1 = pmov %p3335_p0 }
 0x17a   : > { %p3343_p3 = pmov %p3335_p0 }
 0x17b   : > { %2646 = dma.done.wait (%p3342_p1), [#allocation21], 16  }
 0x17c   : > { %2648 = vsyncadd (%p3343_p3), [#allocation21], 4294967280  ;;  %v3154_v0 = vld [vmem:[#allocation5] sm:$0xff]  ;;  %v3156_v1 = vld [vmem:[#allocation5 + $0x8] sm:$0xff]  ;;  %vm626_vm0 = vcmask 130048   ;;  %s3300_s0 = sshll.u32 %s3122_s14, 4 }
 0x17d   : > { %v3158_v2 = vld [vmem:[%s528_s30] sm:$0xff]   ;;  %v1875_v3 = vpack.c.bf16 %v3156_v1, %v3154_v0  ;;  %v712_v8 = vld [vmem:[#allocation7 + $0x10] sm:$0xff]  ;;  %v713_v9 = vld [vmem:[#allocation7 + $0x18] sm:$0xff]  ;;  %s612_s15 = scalar_lea.vmem [#allocation22], %s3300_s0  ;;  %s3301_s12 = sshll.u32 %s3331_s2, 8 }
 0x17e   : > { %v1586_v4 = vunpack.c.l.bf16 %v3158_v2  ;;  %v710_v5 = vld [vmem:[#allocation7] sm:$0xff]  ;;  %v711_v6 = vld [vmem:[#allocation7 + $0x8] sm:$0xff]  ;;  %v1587_v10 = vunpack.c.h.bf16 %v3158_v2  ;;  %v1883_v11 = vpack.c.bf16 %v713_v9, %v712_v8  ;;  %v716_v15 = vld [vmem:[#allocation7 + $0x30] sm:$0xff]  ;;  %s1306_s16 = sshll.u32 %s612_s15, 4  ;;  %s3344_s22 = sld [smem:[#allocation42_spill]]  ;;  %s3182_s16 = int_to_ptr.vmem [resolvable:$true] %s1306_s16 }
 0x17f   : > { %v1879_v7 = vpack.c.bf16 %v711_v6, %v710_v5  ;;  %1876 = vmatprep.subr.bf16.mxu1 %v1875_v3  ;;  %v714_v12 = vld [vmem:[#allocation7 + $0x20] sm:$0xff]  ;;  %v715_v13 = vld [vmem:[#allocation7 + $0x28] sm:$0xff]  ;;  %v717_v16 = vld [vmem:[#allocation7 + $0x38] sm:$0xff]  ;;  %s2549_s29 = scalar_lea.vmem %s3182_s16, 256  ;;  %p3345_p8 = scmp.ne.s32.totalorder %s3325_s17, 0 }
 0x180   : > { %1690 = vmatprep.mubr.msk.f32.mxu1 %vm626_vm0, %v1586_v4  ;;  %1878 = vmatpush3.bf16.msra.mxu1 %v1875_v3  ;;  %v1887_v14 = vpack.c.bf16 %v715_v13, %v714_v12  ;;  %v1891_v17 = vpack.c.bf16 %v717_v16, %v716_v15  ;;  %v718_v18 = vld [vmem:[#allocation7 + $0x40] sm:$0xff]  ;;  %v719_v19 = vld [vmem:[#allocation7 + $0x48] sm:$0xff]  ;;  %v720_v21 = vld [vmem:[#allocation7 + $0x50] sm:$0xff]  ;;  %p2550_p2 = scmp.ne.s32.totalorder %s3182_s16, %s2549_s29  ;;  %s2689_s30 = smov [#allocation22]  }
 0x181   : > { %1880 = vmatprep.subr.bf16.mxu1 %v1879_v7  ;;  %v1895_v20 = vpack.c.bf16 %v719_v19, %v718_v18  ;;  %v721_v22 = vld [vmem:[#allocation7 + $0x58] sm:$0xff]  ;;  %v722_v24 = vld [vmem:[#allocation7 + $0x60] sm:$0xff]  ;;  %v723_v25 = vld [vmem:[#allocation7 + $0x68] sm:$0xff] }
 0x182   : > { %v1899_v23 = vpack.c.bf16 %v721_v22, %v720_v21  ;;  %v1903_v26 = vpack.c.bf16 %v723_v25, %v722_v24  ;;  %v724_v27 = vld [vmem:[#allocation7 + $0x70] sm:$0xff]  ;;  %v725_v28 = vld [vmem:[#allocation7 + $0x78] sm:$0xff]  ;;  %v810_v30 = vld [vmem:[#allocation10] sm:$0xff]  ;;  %p2551_p6 = pnand %p2550_p2, %p3345_p8 }
 0x183   : > { %1691 = vmatmul.mubr.msk.f32.vlgmr.msra.gmra.mrb[0].mxu1 %vm626_vm0, %v1587_v10  ;;  %v1907_v29 = vpack.c.bf16 %v725_v28, %v724_v27  ;;  %v811_v31 = vld [vmem:[#allocation10 + $0x8] sm:$0xff]  ;;  %v812_v32 = vld [vmem:[#allocation10 + $0x10] sm:$0xff]  ;;  %v813_v34 = vld [vmem:[#allocation10 + $0x18] sm:$0xff] }
 0x184   : > { %1882 = vmatpush3.bf16.msra.mxu1 %v1879_v7  ;;  %v1911_v33 = vpack.c.bf16 %v811_v31, %v810_v30  ;;  %v1915_v35 = vpack.c.bf16 %v813_v34, %v812_v32  ;;  %v814_v36 = vld [vmem:[#allocation10 + $0x20] sm:$0xff]  ;;  %v815_v37 = vld [vmem:[#allocation10 + $0x28] sm:$0xff]  ;;  %v816_v39 = vld [vmem:[#allocation10 + $0x30] sm:$0xff]  ;;  %s3189_s24 = scalar_lea.hbm %s3344_s22, %s3301_s12  ;;  %p2552_p10 = pneg %p2551_p6 }
 0x185   : > { %1884 = vmatprep.subr.bf16.mxu1 %v1883_v11  ;;  %v1919_v38 = vpack.c.bf16 %v815_v37, %v814_v36  ;;  %v817_v40 = vld [vmem:[#allocation10 + $0x38] sm:$0xff]  ;;  %v818_v42 = vld [vmem:[#allocation10 + $0x40] sm:$0xff]  ;;  %v819_v43 = vld [vmem:[#allocation10 + $0x48] sm:$0xff] }
 0x186   : > { %1912 = vmatprep.subr.bf16.mxu0 %v1911_v33  ;;  %v1923_v41 = vpack.c.bf16 %v817_v40, %v816_v39  ;;  %v1927_v44 = vpack.c.bf16 %v819_v43, %v818_v42  ;;  %v820_v45 = vld [vmem:[#allocation10 + $0x50] sm:$0xff]  ;;  %v821_v46 = vld [vmem:[#allocation10 + $0x58] sm:$0xff]  ;;  %v822_v48 = vld [vmem:[#allocation10 + $0x60] sm:$0xff] }
 0x187   : > { %1914 = vmatpush3.bf16.msra.mxu0 %v1911_v33  ;;  %v1931_v47 = vpack.c.bf16 %v821_v46, %v820_v45  ;;  %v823_v49 = vld [vmem:[#allocation10 + $0x68] sm:$0xff]  ;;  %v824_v55 = vld [vmem:[#allocation10 + $0x70] sm:$0xff]  ;;  %v825_v56 = vld [vmem:[#allocation10 + $0x78] sm:$0xff] }
 0x188   : > { %1886 = vmatpush3.bf16.msra.mxu1 %v1883_v11  ;;  %1916 = vmatprep.subr.bf16.mxu0 %v1915_v35  ;;  %v1935_v50 = vpack.c.bf16 %v823_v49, %v822_v48  ;;  %v1939_v57 = vpack.c.bf16 %v825_v56, %v824_v55  ;;  %v1566_v58 = vld [vmem:[#allocation8] ss:$0 sm:$0xff]  ;;  %v988_v3 = vld [vmem:[#allocation13 + $0x8] sm:$0xff]  ;;  %v989_v5 = vld [vmem:[#allocation13 + $0x10] sm:$0xff] }
 0x189   : > { %1888 = vmatprep.subr.bf16.mxu1 %v1887_v14  ;;  %v990_v7 = vld [vmem:[#allocation13 + $0x18] sm:$0xff]  ;;  %v991_v8 = vld [vmem:[#allocation13 + $0x20] sm:$0xff]  ;;  %v992_v9 = vld [vmem:[#allocation13 + $0x28] sm:$0xff] }
 0x18a   : > { %v1955_v11 = vpack.c.bf16 %v992_v9, %v991_v8  ;;  %v993_v12 = vld [vmem:[#allocation13 + $0x30] sm:$0xff]  ;;  %v994_v13 = vld [vmem:[#allocation13 + $0x38] sm:$0xff]  ;;  %v995_v15 = vld [vmem:[#allocation13 + $0x40] sm:$0xff] }
 0x18b   : > { %1918 = vmatpush3.bf16.msra.mxu0 %v1915_v35  ;;  %v996_v16 = vld [vmem:[#allocation13 + $0x48] sm:$0xff]  ;;  %v997_v18 = vld [vmem:[#allocation13 + $0x50] sm:$0xff]  ;;  %v998_v19 = vld [vmem:[#allocation13 + $0x58] sm:$0xff] }
 0x18c   : > { %1890 = vmatpush3.bf16.msra.mxu1 %v1887_v14  ;;  %1920 = vmatprep.subr.bf16.mxu0 %v1919_v38  ;;  %v1959_v14 = vpack.c.bf16 %v994_v13, %v993_v12  ;;  %v999_v21 = vld [vmem:[#allocation13 + $0x60] sm:$0xff]  ;;  %v1000_v22 = vld [vmem:[#allocation13 + $0x68] sm:$0xff]  ;;  %v1567_v24 = vld [vmem:[#allocation11] ss:$0 sm:$0xff] }
 0x18d   : > { %1892 = vmatprep.subr.bf16.mxu1 %v1891_v17  ;;  %v1001_v32 = vld [vmem:[#allocation13 + $0x70] sm:$0xff]  ;;  %v1002_v33 = vld [vmem:[#allocation13 + $0x78] sm:$0xff]  ;;  %v1087_v35 = vld [vmem:[#allocation16] sm:$0xff] }
 0x18e   : > { %v1975_v34 = vpack.c.bf16 %v1002_v33, %v1001_v32  ;;  %v1088_v36 = vld [vmem:[#allocation16 + $0x8] sm:$0xff]  ;;  %v1089_v37 = vld [vmem:[#allocation16 + $0x10] sm:$0xff]  ;;  %v1090_v39 = vld [vmem:[#allocation16 + $0x18] sm:$0xff] }
 0x18f   : > { %1922 = vmatpush3.bf16.msra.mxu0 %v1919_v38  ;;  %v1979_v38 = vpack.c.bf16 %v1088_v36, %v1087_v35  ;;  %v1983_v40 = vpack.c.bf16 %v1090_v39, %v1089_v37  ;;  %v1092_v42 = vld [vmem:[#allocation16 + $0x28] sm:$0xff]  ;;  %v1093_v2 = vld [vmem:[#allocation16 + $0x30] sm:$0xff]  ;;  %v1095_v45 = vld [vmem:[#allocation16 + $0x40] sm:$0xff] }
 0x190   : > { %1894 = vmatpush3.bf16.msra.mxu1 %v1891_v17  ;;  %1924 = vmatprep.subr.bf16.mxu0 %v1923_v41  ;;  %v1963_v17 = vpack.c.bf16 %v996_v16, %v995_v15  ;;  %v1096_v46 = vld [vmem:[#allocation16 + $0x48] sm:$0xff]  ;;  %v1097_v48 = vld [vmem:[#allocation16 + $0x50] sm:$0xff]  ;;  %v1098_v49 = vld [vmem:[#allocation16 + $0x58] sm:$0xff] }
 0x191   : > { %1896 = vmatprep.subr.bf16.mxu1 %v1895_v20  ;;  %v1194_v8 = vld [vmem:[#allocation19 + $0x38] sm:$0xff]  ;;  %v1196_v12 = vld [vmem:[#allocation19 + $0x48] sm:$0xff] }
 0x192   : > { %v1198_v15 = vld [vmem:[#allocation19 + $0x58] sm:$0xff] }
 0x193   : > { %1926 = vmatpush3.bf16.msra.mxu0 %v1923_v41  ;;  %v1091_v41 = vld [vmem:[#allocation16 + $0x20] sm:$0xff] }
 0x194   : > { %1898 = vmatpush3.bf16.msra.mxu1 %v1895_v20  ;;  %1928 = vmatprep.subr.bf16.mxu0 %v1927_v44  ;;  %v1967_v20 = vpack.c.bf16 %v998_v19, %v997_v18  ;;  %v1987_v43 = vpack.c.bf16 %v1092_v42, %v1091_v41  ;;  %v1200_v18 = vld [vmem:[#allocation19 + $0x68] sm:$0xff] }
 0x195   : > { %1900 = vmatprep.subr.bf16.mxu1 %v1899_v23 }
 0x197   : > { %1930 = vmatpush3.bf16.msra.mxu0 %v1927_v44  ;;  %v1094_v44 = vld [vmem:[#allocation16 + $0x38] sm:$0xff] }
 0x198   : > { %1902 = vmatpush3.bf16.msra.mxu1 %v1899_v23  ;;  %1932 = vmatprep.subr.bf16.mxu0 %v1931_v47  ;;  %v1971_v23 = vpack.c.bf16 %v1000_v22, %v999_v21 }
 0x199   : > { %1904 = vmatprep.subr.bf16.mxu1 %v1903_v26 }
 0x19b   : > { %1934 = vmatpush3.bf16.msra.mxu0 %v1931_v47  ;;  %v1995_v47 = vpack.c.bf16 %v1096_v46, %v1095_v45 }
 0x19c   : > { %1906 = vmatpush3.bf16.msra.mxu1 %v1903_v26  ;;  %1936 = vmatprep.subr.bf16.mxu0 %v1935_v50 }
 0x19d   : > { %1908 = vmatprep.subr.bf16.mxu1 %v1907_v29 }
 0x19f   : > { %1938 = vmatpush3.bf16.msra.mxu0 %v1935_v50  ;;  %v1999_v50 = vpack.c.bf16 %v1098_v49, %v1097_v48 }
 0x1a0   : > { %1910 = vmatpush3.bf16.msra.mxu1 %v1907_v29  ;;  %1940 = vmatprep.subr.bf16.mxu0 %v1939_v57 }
 0x1a3   : > { %1942 = vmatpush3.bf16.msra.mxu0 %v1939_v57 }
 0x256   : > { %v1692_v51 = vpop.f32.mrb[0].mxu1 }
 0x257   : > { %v699_v52 = vpop.f32.mrb[1].mxu1  ;;  %v709_v54 = vadd.f32 %v1692_v51, %v3156_v1  ;;  %v987_v1 = vld [vmem:[#allocation13] sm:$0xff] }
 0x258   : > { %v708_v53 = vadd.f32 %v699_v52, %v3154_v0  ;;  %v1947_v6 = vpack.c.bf16 %v988_v3, %v987_v1  ;;  %v1099_v51 = vld [vmem:[#allocation16 + $0x60] sm:$0xff]  ;;  %v1100_v52 = vld [vmem:[#allocation16 + $0x68] sm:$0xff] }
 0x259   : > { %v1190_v1 = vld [vmem:[#allocation19 + $0x18] sm:$0xff] }
 0x25a   : > { %1725 = vmatprep.mubr.f32.mxu1 %v708_v53  ;;  %1948 = vmatprep.subr.bf16.mxu0 %v1947_v6  ;;  %v2003_v53 = vpack.c.bf16 %v1100_v52, %v1099_v51 }
 0x25b   : > { %1726 = vmatmul.mubr.f32.vlgmr.msra.gmra.mrb[2].mxu1 %v709_v54 }
 0x25c   : > { %1767 = vmatprep.mubr.msk.f32.mxu1 %vm626_vm0, %v1586_v4  ;;  %v1951_v4 = vpack.c.bf16 %v990_v7, %v989_v5  ;;  %v1191_v5 = vld [vmem:[#allocation19 + $0x20] sm:$0xff] }
 0x32e   : > { %v1727_v59 = vpop.f32.mrb[2].mxu1 }
 0x32f   : > { %v805_v60 = vadd.f32 %v1727_v59, %v1566_v58  ;;  %v799_v61 = vpop.f32.mrb[3].mxu1  ;;  %v1102_v59 = vld [vmem:[#allocation16 + $0x78] sm:$0xff] }
 0x330   : > { %v800_v62 = vadd.f32 %v1566_v58, %v799_v61  ;;  %v1101_v58 = vld [vmem:[#allocation16 + $0x70] sm:$0xff]  ;;  %v1187_v61 = vld [vmem:[#allocation19] sm:$0xff] }
 0x331   : > { %v809_v0 = vmax.f32 %v805_v60, 0.0  ;;  %v2007_v60 = vpack.c.bf16 %v1102_v59, %v1101_v58 }
 0x332   : > { %v808_v63 = vmax.f32 %v800_v62, 0.0  ;;  %v1188_v62 = vld [vmem:[#allocation19 + $0x8] sm:$0xff] }
 0x334   : > { %1760 = vmatprep.mubr.f32.mxu0 %v808_v63  ;;  %v1189_v63 = vld [vmem:[#allocation19 + $0x10] sm:$0xff] }
 0x335   : > { %1761 = vmatmul.mubr.f32.vlgmr.msra.gmra.mrb[0].mxu0 %v809_v0  ;;  %v2011_v0 = vpack.c.bf16 %v1188_v62, %v1187_v61  ;;  %v2015_v3 = vpack.c.bf16 %v1190_v1, %v1189_v63 }
 0x336   : > { %1950 = vmatpush3.bf16.msra.mxu0 %v1947_v6  ;;  %v1192_v6 = vld [vmem:[#allocation19 + $0x28] sm:$0xff] }
 0x337   : > { %1952 = vmatprep.subr.bf16.mxu0 %v1951_v4  ;;  %v2019_v7 = vpack.c.bf16 %v1192_v6, %v1191_v5 }
 0x33a   : > { %1954 = vmatpush3.bf16.msra.mxu0 %v1951_v4  ;;  %v1193_v4 = vld [vmem:[#allocation19 + $0x30] sm:$0xff] }
 0x33b   : > { %1956 = vmatprep.subr.bf16.mxu0 %v1955_v11  ;;  %v2023_v9 = vpack.c.bf16 %v1194_v8, %v1193_v4 }
 0x33e   : > { %1958 = vmatpush3.bf16.msra.mxu0 %v1955_v11  ;;  %v1195_v11 = vld [vmem:[#allocation19 + $0x40] sm:$0xff] }
 0x33f   : > { %1960 = vmatprep.subr.bf16.mxu0 %v1959_v14  ;;  %v2027_v13 = vpack.c.bf16 %v1196_v12, %v1195_v11 }
 0x342   : > { %1962 = vmatpush3.bf16.msra.mxu0 %v1959_v14  ;;  %v1197_v14 = vld [vmem:[#allocation19 + $0x50] sm:$0xff] }
 0x343   : > { %1964 = vmatprep.subr.bf16.mxu0 %v1963_v17  ;;  %v2031_v16 = vpack.c.bf16 %v1198_v15, %v1197_v14 }
 0x346   : > { %1966 = vmatpush3.bf16.msra.mxu0 %v1963_v17  ;;  %v1199_v17 = vld [vmem:[#allocation19 + $0x60] sm:$0xff] }
 0x347   : > { %1968 = vmatprep.subr.bf16.mxu0 %v1967_v20  ;;  %v2035_v19 = vpack.c.bf16 %v1200_v18, %v1199_v17 }
 0x34a   : > { %1970 = vmatpush3.bf16.msra.mxu0 %v1967_v20  ;;  %v1570_v20 = vld [vmem:[#allocation14] ss:$0 sm:$0xff] }
 0x34b   : > { %1972 = vmatprep.subr.bf16.mxu0 %v1971_v23 }
 0x34e   : > { %1974 = vmatpush3.bf16.msra.mxu0 %v1971_v23 }
 0x34f   : > { %1976 = vmatprep.subr.bf16.mxu0 %v1975_v34 }
 0x352   : > { %1978 = vmatpush3.bf16.msra.mxu0 %v1975_v34 }
 0x353   : > { %2012 = vmatprep.subr.bf16.mxu0 %v2011_v0 }
 0x408   : > { %v1762_v25 = vpop.f32.mrb[0].mxu0 }
 0x409   : > { %v905_v26 = vadd.f32 %v1762_v25, %v1567_v24  ;;  %v899_v27 = vpop.f32.mrb[1].mxu0 }
 0x40a   : > { %v900_v28 = vadd.f32 %v1567_v24, %v899_v27  ;;  %v1201_v27 = vld [vmem:[#allocation19 + $0x70] sm:$0xff] }
 0x40b   : > { %v909_v29 = vmax.f32 %v905_v26, 0.0 }
 0x40c   : > { %v908_v30 = vmax.f32 %v900_v28, 0.0  ;;  %v1202_v28 = vld [vmem:[#allocation19 + $0x78] sm:$0xff] }
 0x40e   : > { %v1943_v31 = vpack.c.bf16 %v909_v29, %v908_v30 }
 0x410   : > { %1944 = vmatprep.subr.bf16.mxu1 %v1943_v31 }
 0x411   : > { %1946 = vmatpush3.bf16.msra.mxu1 %v1943_v31 }
 0x412   : > { %1980 = vmatprep.subr.bf16.mxu1 %v1979_v38 }
 0x414   : > { %1768 = vmatmul.mubr.msk.f32.vlgmr.msra.gmra.mrb[4].mxu1 %vm626_vm0, %v1587_v10  ;;  %v1991_v10 = vpack.c.bf16 %v1094_v44, %v1093_v2 }
 0x415   : > { %1982 = vmatpush3.bf16.msra.mxu1 %v1979_v38 }
 0x416   : > { %1984 = vmatprep.subr.bf16.mxu1 %v1983_v40 }
 0x419   : > { %1986 = vmatpush3.bf16.msra.mxu1 %v1983_v40 }
 0x41a   : > { %1988 = vmatprep.subr.bf16.mxu1 %v1987_v43 }
 0x41d   : > { %1990 = vmatpush3.bf16.msra.mxu1 %v1987_v43 }
 0x41e   : > { %1992 = vmatprep.subr.bf16.mxu1 %v1991_v10 }
 0x421   : > { %1994 = vmatpush3.bf16.msra.mxu1 %v1991_v10 }
 0x422   : > { %1996 = vmatprep.subr.bf16.mxu1 %v1995_v47 }
 0x425   : > { %1998 = vmatpush3.bf16.msra.mxu1 %v1995_v47 }
 0x426   : > { %2000 = vmatprep.subr.bf16.mxu1 %v1999_v50 }
 0x429   : > { %2002 = vmatpush3.bf16.msra.mxu1 %v1999_v50 }
 0x42a   : > { %2004 = vmatprep.subr.bf16.mxu1 %v2003_v53 }
 0x42d   : > { %2006 = vmatpush3.bf16.msra.mxu1 %v2003_v53 }
 0x42e   : > { %2008 = vmatprep.subr.bf16.mxu1 %v2007_v60 }
 0x431   : > { %2010 = vmatpush3.bf16.msra.mxu1 %v2007_v60 }
 0x4e7   : > { %v1769_v54 = vpop.f32.mrb[4].mxu1 }
 0x4e8   : > { %v976_v55 = vpop.f32.mrb[5].mxu1  ;;  %v986_v57 = vadd.f32 %v1769_v54, %v909_v29  ;;  %v2039_v29 = vpack.c.bf16 %v1202_v28, %v1201_v27 }
 0x4e9   : > { %v985_v56 = vadd.f32 %v976_v55, %v908_v30  ;;  %v1571_v30 = vld [vmem:[#allocation17] ss:$0 sm:$0xff] }
 0x4eb   : > { %1802 = vmatprep.mubr.f32.mxu0 %v985_v56 }
 0x4ec   : > { %1803 = vmatmul.mubr.f32.vlgmr.msra.gmra.mrb[2].mxu0 %v986_v57 }
 0x4ed   : > { %2014 = vmatpush3.bf16.msra.mxu0 %v2011_v0 }
 0x4ee   : > { %2016 = vmatprep.subr.bf16.mxu0 %v2015_v3 }
 0x4f1   : > { %2018 = vmatpush3.bf16.msra.mxu0 %v2015_v3 }
 0x4f2   : > { %2020 = vmatprep.subr.bf16.mxu0 %v2019_v7 }
 0x4f5   : > { %2022 = vmatpush3.bf16.msra.mxu0 %v2019_v7 }
 0x4f6   : > { %2024 = vmatprep.subr.bf16.mxu0 %v2023_v9 }
 0x4f9   : > { %2026 = vmatpush3.bf16.msra.mxu0 %v2023_v9 }
 0x4fa   : > { %2028 = vmatprep.subr.bf16.mxu0 %v2027_v13 }
 0x4fd   : > { %2030 = vmatpush3.bf16.msra.mxu0 %v2027_v13 }
 0x4fe   : > { %2032 = vmatprep.subr.bf16.mxu0 %v2031_v16 }
 0x501   : > { %2034 = vmatpush3.bf16.msra.mxu0 %v2031_v16 }
 0x502   : > { %2036 = vmatprep.subr.bf16.mxu0 %v2035_v19 }
 0x505   : > { %2038 = vmatpush3.bf16.msra.mxu0 %v2035_v19 }
 0x506   : > { %2040 = vmatprep.subr.bf16.mxu0 %v2039_v29 }
 0x509   : > { %2042 = vmatpush3.bf16.msra.mxu0 %v2039_v29 }
 0x5bf   : > { %v1804_v21 = vpop.f32.mrb[2].mxu0 }
 0x5c0   : > { %v1082_v22 = vadd.f32 %v1804_v21, %v1570_v20  ;;  %v1076_v23 = vpop.f32.mrb[3].mxu0 }
 0x5c1   : > { %v1077_v24 = vadd.f32 %v1570_v20, %v1076_v23 }
 0x5c2   : > { %v1086_v26 = vmax.f32 %v1082_v22, 0.0 }
 0x5c3   : > { %v1085_v25 = vmax.f32 %v1077_v24, 0.0 }
 0x5c5   : > { %1837 = vmatprep.mubr.f32.mxu1 %v1085_v25 }
 0x5c6   : > { %1838 = vmatmul.mubr.f32.vlgmr.msra.gmra.mrb[6].mxu1 %v1086_v26 }
 0x699   : > { %v1839_v31 = vpop.f32.mrb[6].mxu1 }
 0x69a   : > { %v1182_v32 = vadd.f32 %v1839_v31, %v1571_v30  ;;  %v1176_v33 = vpop.f32.mrb[7].mxu1 }
 0x69b   : > { %v1177_v34 = vadd.f32 %v1571_v30, %v1176_v33 }
 0x69c   : > { %1186 = vst [vmem:[%s612_s15 + $0x8] sm:$0xff] %v1182_v32 }
 0x69d   : > { %1185 = vst [vmem:[%s612_s15] sm:$0xff] %v1177_v34  ;;  %1872 = vmatprep.mubr.f32.mxu0 %v1177_v34  ;;  %s2553_s15 = sshll.u32 %s2689_s30, 4  ;;  %s2554_s15 = int_to_ptr.vmem [resolvable:$false] %s2553_s15 }
 0x69e   : > { %1873 = vmatmul.mubr.f32.vlgmr.msra.gmra.mrb[4].mxu0 %v1182_v32  ;;  %s2555_s0 = scalar_lea.vmem %s2554_s15, 512  ;;  %p2556_p11 = scmp.lt.s32.totalorder %s3182_s16, %s2554_s15 }
 0x69f   : > { %p2557_p0 = scmp.lt.s32.totalorder %s2555_s0, %s2549_s29 }
 0x6a1   : > { %p2558_p5 = por %p2557_p0, %p2556_p11 }
 0x6a3   : > { %p2559_p9 = pnand %p2558_p5, %p2552_p10 }
 0x6a5   : > { %2562 = shalt.err (!%p2559_p9)
}
 0x6a6   : > { %s2563_s21 = scalar_lea.hbm %s3189_s24, 256  ;;  %s2567_s30 = scalar_lea.hbm %s3344_s22, 512 }
 0x6a7   : > { %p2564_p7 = scmp.ne.s32.totalorder %s3189_s24, %s2563_s21  ;;  %p2568_p13 = scmp.lt.u32.totalorder %s3189_s24, %s3344_s22 }
 0x6a8   : > { %p2569_p1 = scmp.lt.u32.totalorder %s2567_s30, %s2563_s21  ;;  %p2571_p2 = scmp.lt.u32.totalorder %s2563_s21, %s3189_s24 }
 0x6a9   : > { %p2565_p4 = pnand %p2564_p7, %p3345_p8 }
 0x6aa   : > { %p2570_p3 = por %p2569_p1, %p2568_p13 }
 0x6ab   : > { %p2566_p12 = pneg %p2565_p4 }
 0x6ac   : > { %p2572_p6 = por %p2571_p2, %p2570_p3 }
 0x6ae   : > { %p2573_p10 = pnand %p2572_p6, %p2566_p12 }
 0x6b0   : > { %2576 = shalt.err (!%p2573_p10)
}
 0x6b1   : > { %s3302_s0 = smov 128   ;;  %s2691_s12 = smov 8   ;;  %v1572_v35 = vld [vmem:[#allocation20] ss:$0 sm:$0xff] }
 0x6b2   : > { %s3346_s20 = scalar_lea.sflag [#allocation4], %s3122_s14  ;;  %s3347_s29 = sshll.u32 %s3122_s14, 4 }
 0x6b3   : > { %2089 = dma.vmem_to_hbm [thread:$0]  (%p3345_p8), %s3182_s16, 256, %s3189_s24, %s3346_s20, %s3302_s0, %s3302_s0, %s2691_s12  }
 0x6b4   : > { %s619_s21 = scalar_lea.vmem [#allocation23], %s3347_s29  ;;  %s3348_s30 = sshll.u32 %s3331_s2, 8 }
 0x6b5   : > { %s1322_s1 = sshll.u32 %s619_s21, 4  ;;  %s3349_s4 = sld [smem:[#allocation43_spill]]  ;;  %s3220_s1 = int_to_ptr.vmem [resolvable:$true] %s1322_s1 }
 0x6b6   : > { %s1293_s16 = scalar_lea.sflag [#allocation24], %s3122_s14  ;;  %s2577_s24 = scalar_lea.vmem %s3220_s1, 256 }
 0x6b7   : > { %p2578_p11 = scmp.ne.s32.totalorder %s3220_s1, %s2577_s24  ;;  %s2692_s20 = smov [#allocation23]  }
 0x6b8   : > { %s2581_s29 = sshll.u32 %s2692_s20, 4  ;;  %s2582_s29 = int_to_ptr.vmem [resolvable:$false] %s2581_s29 }
 0x6b9   : > { %p2579_p0 = pnand %p2578_p11, %p3345_p8  ;;  %s2583_s0 = scalar_lea.vmem %s2582_s29, 512 }
 0x6ba   : > { %p2584_p9 = scmp.lt.s32.totalorder %s3220_s1, %s2582_s29  ;;  %p2585_p7 = scmp.lt.s32.totalorder %s2583_s0, %s2577_s24 }
 0x6bb   : > { %s3227_s5 = scalar_lea.hbm %s3349_s4, %s3348_s30  ;;  %p2580_p5 = pneg %p2579_p0 }
 0x6bc   : > { %p2586_p4 = por %p2585_p7, %p2584_p9 }
 0x6be   : > { %p2587_p12 = pnand %p2586_p4, %p2580_p5 }
 0x771   : > { %v1874_v36 = vpop.f32.mrb[4].mxu0 }
 0x772   : > { %v1282_v37 = vadd.f32 %v1874_v36, %v1572_v35  ;;  %v1276_v38 = vpop.f32.mrb[5].mxu0 }
 0x773   : > { %v1277_v39 = vadd.f32 %v1572_v35, %v1276_v38 }
 0x774   : > { %1286 = vst [vmem:[%s619_s21 + $0x8] sm:$0xff] %v1282_v37 }
 0x775   : > { %1285 = vst [vmem:[%s619_s21] sm:$0xff] %v1277_v39 }
 0x776   : > { %2590 = shalt.err (!%p2587_p12)
}
 0x777   : > { %s2591_s2 = scalar_lea.hbm %s3227_s5, 256  ;;  %s2595_s30 = scalar_lea.hbm %s3349_s4, 512 }
 0x778   : > { %p2592_p13 = scmp.ne.s32.totalorder %s3227_s5, %s2591_s2  ;;  %p2596_p2 = scmp.lt.u32.totalorder %s3227_s5, %s3349_s4 }
 0x779   : > { %p2597_p6 = scmp.lt.u32.totalorder %s2595_s30, %s2591_s2  ;;  %p2599_p11 = scmp.lt.u32.totalorder %s2591_s2, %s3227_s5 }
 0x77a   : > { %p2593_p1 = pnand %p2592_p13, %p3345_p8 }
 0x77b   : > { %p2598_p10 = por %p2597_p6, %p2596_p2 }
 0x77c   : > { %p2594_p3 = pneg %p2593_p1 }
 0x77d   : > { %p2600_p0 = por %p2599_p11, %p2598_p10 }
 0x77f   : > { %p2601_p5 = pnand %p2600_p0, %p2594_p3 }
 0x781   : > { %2604 = shalt.err (!%p2601_p5)
}
 0x782   : > { %s3350_s0 = smov 128  }
 0x783   : > { %2090 = dma.vmem_to_hbm [thread:$0]  (%p3345_p8), %s3220_s1, 256, %s3227_s5, %s1293_s16, %s3350_s0, %s3350_s0, %s2691_s12  }
 0x784 PF: > { %s1337_s24 = sand.u32 1, %s2659_s25   ;;  %p3351_p9 = scmp.ne.s32.totalorder %s3326_s23, 0 }
 0x785   : > { %p3352_p7 = scmp.ge.s32.totalorder %s2671_s28, 2  ;;  %s1338_s29 = scalar_lea.sflag [#allocation4], %s1337_s24 }
 0x787   : > { %p2132_p4 = pnand %p3352_p7, %p3351_p9 }
 0x789   : > { %2650 = dma.done.wait (!%p2132_p4), %s1338_s29, 256  }
 0x78a   : > { %2652 = vsyncadd (!%p2132_p4), %s1338_s29, 4294967040  ;;  %s1347_s17 = scalar_lea.sflag [#allocation24], %s1337_s24 }
 0x78b   : > { %2654 = dma.done.wait (!%p2132_p4), %s1347_s17, 256  }
 0x78c   : > { %2656 = vsyncadd (!%p2132_p4), %s1347_s17, 4294967040  ;;  %p36_p8 = scmp.ge.s32.totalorder %s3049_s18, 4   ;;  %s3353_s25 = smov %s2663_s26 }
 0x78d   : > { %s3354_s26 = smov %s2667_s27  ;;  %s3355_s27 = smov %s3061_s19 }
 0x78e   : > { %s3356_s28 = smov %s3049_s18  ;;  %38 = sbr.rel (!%p36_p8) target bundleno = 22 (0x16), region = 174 }
 0x795   :  { %1352 = vsyncpa [#allocation3], 1 }
 0x796   :  { %1354 = vsyncpa [#allocation3 + $0x1], 1 }
 0x797   :  { %1355 = vsyncpa [#allocation6], 1 }
 0x798   :  { %1356 = vsyncpa [#allocation9], 1 }
 0x799   :  { %1357 = vsyncpa [#allocation12], 1 }
 0x79a   :  { %1358 = vsyncpa [#allocation15], 1 }
 0x79b   :  { %1359 = vsyncpa [#allocation18], 1 }
 0x79c   :  { %1360 = vsyncpa [#allocation21], 1 }
 0x79d   :  { %1361 = vsyncpa [#allocation4], 1 }
 0x79e   :  { %1363 = vsyncpa [#allocation4 + $0x1], 1 }
 0x79f   :  { %1364 = vsyncpa [#allocation24], 1 }
 0x7a0   :  { %1366 = vsyncpa [#allocation24 + $0x1], 1 }

</bundles_post_ra>
